<compile_context>
chip_gen: v7x
topology: tpu7x:2x2x1
jax: 0.10.0
libtpu: 0.0.40
codegen_flags: <defaults>
</compile_context>

<pallas_src>
import jax
import jax.numpy as jnp
from jax.experimental import pallas as pl
from jax.experimental.pallas import tpu as pltpu


# ------------------------------ kernel ---------------------------------------

def _gin_layer(a_bf, x0, x1, w1, b1, gamma, beta, w2, b2):
    """One GINConv(GINAggr) layer applied to the real (x0) and perturbed (x1)
    branches.  a_bf / w1 / w2 are bf16 MXU operands; everything else is f32."""
    n = x0.shape[0]

    # GIN aggregation per branch: (1 + eps) * x_i + sum_{j->i} x_j, eps = 0.
    # Matmul operands in bf16, residual add kept in f32.
    agg0 = jnp.dot(a_bf, x0.astype(jnp.bfloat16),
                   preferred_element_type=jnp.float32) + x0
    agg1 = jnp.dot(a_bf, x1.astype(jnp.bfloat16),
                   preferred_element_type=jnp.float32) + x1

    # Linear 1 on stacked rows (2N, F) -> better MXU M-dim occupancy.
    h = jnp.concatenate([agg0, agg1], axis=0).astype(jnp.bfloat16)
    z = jnp.dot(h, w1, preferred_element_type=jnp.float32) + b1        # (2N, H)

    # BatchNorm1d (training mode, biased batch stats) + ReLU, PER BRANCH.
    def bn_relu(zz):
        mu = jnp.mean(zz, axis=0, keepdims=True)
        var = jnp.mean(jnp.square(zz - mu), axis=0, keepdims=True)
        zn = (zz - mu) * jax.lax.rsqrt(var + 1e-5) * gamma + beta
        return jnp.maximum(zn, 0.0)

    h2 = jnp.concatenate([bn_relu(z[:n]), bn_relu(z[n:])],
                         axis=0).astype(jnp.bfloat16)                  # (2N, H)

    # Linear 2 + ReLU, again on stacked rows.
    z2 = jnp.dot(h2, w2, preferred_element_type=jnp.float32) + b2      # (2N, O)
    y = jnp.maximum(z2, 0.0)
    return y[:n], y[n:]


def inspection_l_kernel(a_ref, xr_ref, xp_ref,
                        w1_ref, b1_ref, g1_ref, be1_ref, w2_ref, b2_ref,
                        w3_ref, b3_ref, g2_ref, be2_ref, w4_ref, b4_ref,
                        wd_ref, loss_ref):
    a = a_ref[...]                                    # (N, N) bf16 adjacency
    xr = xr_ref[...]                                  # (N, F) f32
    xp = xp_ref[...]                                  # (N, F) f32  (pre-permuted)

    # ---- conv1 ----
    h1r, h1p = _gin_layer(a, xr, xp,
                          w1_ref[...], b1_ref[...], g1_ref[...], be1_ref[...],
                          w2_ref[...], b2_ref[...])
    # ---- conv2 ----
    yr, yp = _gin_layer(a, h1r, h1p,
                        w3_ref[...], b3_ref[...], g2_ref[...], be2_ref[...],
                        w4_ref[...], b4_ref[...])

    n = yr.shape[0]
    # readout: s = sigmoid(mean over nodes of real embedding) -> (1, D)
    s = jax.nn.sigmoid(jnp.mean(yr, axis=0, keepdims=True))

    # discriminator, reassociated: (x @ Wd^T) @ s^T == x @ (s @ Wd)^T
    u = jnp.dot(s, wd_ref[...], preferred_element_type=jnp.float32)    # (1, D)
    pr = jax.nn.sigmoid(jnp.sum(yr * u, axis=1, keepdims=True))        # (N, 1) target 1
    pp = jax.nn.sigmoid(jnp.sum(yp * u, axis=1, keepdims=True))        # (N, 1) target 0

    # BCELoss with torch's log clamp at -100, mean over all 2N elements.
    total = jnp.sum(-jnp.maximum(jnp.log(pr), -100.0)
                    - jnp.maximum(jnp.log(1.0 - pp), -100.0))
    # lane-dense (1, 128) output slab; scalar sliced outside the kernel.
    loss_ref[...] = jnp.full((1, 128), total / (2.0 * n), dtype=jnp.float32)


# ------------------------------ wrapper --------------------------------------

def _full_spec(shape):
    # Whole-array block (block_shape == array shape satisfies the (8,128) rule).
    return pl.BlockSpec(shape, lambda i: (0,) * len(shape))


def inspection_l_forward(params, x, ei, perm_key):
    """Equivalent of InspectionL.forward(x, ei): returns the scalar DGI BCE loss."""
    n = x.shape[0]
    # dense adjacency from edge_index: A[target, source] = multiplicity (glue).
    # Edge multiplicities are small integers -> exactly representable in bf16.
    a = (jnp.zeros((n, n), jnp.float32)
         .at[ei[1], ei[0]].add(1.0)
         .astype(jnp.bfloat16))

    # Corrupt(): random row permutation (torch.randperm equivalent), outside kernel.
    perm = jax.random.permutation(perm_key, n)
    x_pert = x[perm]

    (w1, b1, g1, be1, w2, b2) = params["conv1"]
    (w3, b3, g2, be2, w4, b4) = params["conv2"]
    wd = params["disc"]

    bf = jnp.bfloat16
    args = (a, x, x_pert,
            w1.astype(bf), b1, g1, be1, w2.astype(bf), b2,
            w3.astype(bf), b3, g2, be2, w4.astype(bf), b4,
            wd)

    out = pl.pallas_call(
        inspection_l_kernel,
        out_shape=jax.ShapeDtypeStruct((1, 128), jnp.float32),
        grid=(1,),
        in_specs=[_full_spec(arg.shape) for arg in args],
        out_specs=_full_spec((1, 128)),
        compiler_params=pltpu.CompilerParams(
            dimension_semantics=("arbitrary",),
            vmem_limit_bytes=64 * 1024 * 1024),
    )(*args)
    return out[0, 0]


# ------------------------------ parameters -----------------------------------

def init_params(key, in_dim, hidden, out=None):
    out_dim = hidden if out is None else out
    gin_default_out = 128  # GINAggr default `out=128` (requires hidden == 128)
    k1, k2, k3 = jax.random.split(key, 3)

    def linear(k, fan_in, fan_out, bias=True):
        kw, kb = jax.random.split(k)
        bound = 1.0 / float(fan_in) ** 0.5
        w = jax.random.uniform(kw, (fan_in, fan_out), jnp.float32, -bound, bound)
        if not bias:
            return w
        b = jax.random.uniform(kb, (1, fan_out), jnp.float32, -bound, bound)
        return w, b

    def gin_aggr(k, i, h, o):
        ka, kb = jax.random.split(k)
        w1, b1 = linear(ka, i, h)                       # stored as (in, out) = W^T
        gamma = jnp.ones((1, h), jnp.float32)           # BatchNorm1d affine init
        beta = jnp.zeros((1, h), jnp.float32)
        w2, b2 = linear(kb, h, o)
        return (w1, b1, gamma, beta, w2, b2)

    return {
        "conv1": gin_aggr(k1, in_dim, hidden, gin_default_out),
        "conv2": gin_aggr(k2, gin_default_out, hidden, out_dim),
        # disc: nn.Linear(out_dim, out_dim, bias=False); stored as the PyTorch
        # (out, in) weight Wd; kernel uses the reassociated form u = s @ Wd.
        "disc": linear(k3, out_dim, out_dim, bias=False),
    }


# ------------------------------ demo ------------------------------------------

if __name__ == "__main__":
    key = jax.random.PRNGKey(0)
    N, E, IN_DIM, HIDDEN = 16, 48, 8, 128   # hidden must be 128 (GINAggr default out)
    k_x, k_src, k_dst, k_param, k_perm = jax.random.split(key, 5)

    x = jax.random.normal(k_x, (N, IN_DIM), jnp.float32)
    src = jax.random.randint(k_src, (E,), 0, N)
    dst = jax.random.randint(k_dst, (E,), 0, N)
    ei = jnp.stack([src, dst])                          # (2, E) edge_index

    params = init_params(k_param, IN_DIM, HIDDEN)
    loss = jax.jit(inspection_l_forward)(params, x, ei, k_perm)
    loss = jax.block_until_ready(loss)

    assert loss.shape == () and bool(jnp.isfinite(loss)), loss
    print("KERNEL_OK")
</pallas_src>

<mosaic_0001>
module attributes {stable_mosaic.version = 11 : i64} {
  func.func private @main(%arg0: i32) attributes {dimension_semantics = [#tpu.dimension_semantics<core_parallel>], iteration_bounds = array<i64: 2>, tpu.core_type = #tpu.core_type<sc_scalar_subcore>, window_params = []} {
    return
  }
}

module attributes {stable_mosaic.version = 11 : i64} {
  func.func private @main(%arg0: i32) attributes {dimension_semantics = [#tpu.dimension_semantics<core_parallel>], iteration_bounds = array<i64: 2>, tpu.core_type = #tpu.core_type<sc_scalar_subcore>, window_params = []} {
    return
  }
}

module attributes {stable_mosaic.version = 11 : i64} {
  func.func @inspection_l_kernel(%arg0: i32, %arg1: memref<16x16xbf16, #tpu.memory_space<vmem>>, %arg2: memref<16x8xf32, #tpu.memory_space<vmem>>, %arg3: memref<16x8xf32, #tpu.memory_space<vmem>>, %arg4: memref<8x128xbf16, #tpu.memory_space<vmem>>, %arg5: memref<1x128xf32, #tpu.memory_space<vmem>>, %arg6: memref<1x128xf32, #tpu.memory_space<vmem>>, %arg7: memref<1x128xf32, #tpu.memory_space<vmem>>, %arg8: memref<128x128xbf16, #tpu.memory_space<vmem>>, %arg9: memref<1x128xf32, #tpu.memory_space<vmem>>, %arg10: memref<128x128xbf16, #tpu.memory_space<vmem>>, %arg11: memref<1x128xf32, #tpu.memory_space<vmem>>, %arg12: memref<1x128xf32, #tpu.memory_space<vmem>>, %arg13: memref<1x128xf32, #tpu.memory_space<vmem>>, %arg14: memref<128x128xbf16, #tpu.memory_space<vmem>>, %arg15: memref<1x128xf32, #tpu.memory_space<vmem>>, %arg16: memref<128x128xf32, #tpu.memory_space<vmem>>, %arg17: memref<1x128xf32, #tpu.memory_space<vmem>>) attributes {dimension_semantics = [#tpu.dimension_semantics<arbitrary>], iteration_bounds = array<i64: 1>, scalar_prefetch = 0 : i64, scratch_operands = 0 : i64, tpu.core_type = #tpu.core_type<tc>, window_params = [{pipeline_mode = #tpu.pipeline_mode<synchronous>, transform_indices = @transform_0, window_bounds = array<i64: 16, 16>}, {pipeline_mode = #tpu.pipeline_mode<synchronous>, transform_indices = @transform_1, window_bounds = array<i64: 16, 8>}, {pipeline_mode = #tpu.pipeline_mode<synchronous>, transform_indices = @transform_2, window_bounds = array<i64: 16, 8>}, {pipeline_mode = #tpu.pipeline_mode<synchronous>, transform_indices = @transform_3, window_bounds = array<i64: 8, 128>}, {pipeline_mode = #tpu.pipeline_mode<synchronous>, transform_indices = @transform_4, window_bounds = array<i64: 1, 128>}, {pipeline_mode = #tpu.pipeline_mode<synchronous>, transform_indices = @transform_5, window_bounds = array<i64: 1, 128>}, {pipeline_mode = #tpu.pipeline_mode<synchronous>, transform_indices = @transform_6, window_bounds = array<i64: 1, 128>}, {pipeline_mode = #tpu.pipeline_mode<synchronous>, transform_indices = @transform_7, window_bounds = array<i64: 128, 128>}, {pipeline_mode = #tpu.pipeline_mode<synchronous>, transform_indices = @transform_8, window_bounds = array<i64: 1, 128>}, {pipeline_mode = #tpu.pipeline_mode<synchronous>, transform_indices = @transform_9, window_bounds = array<i64: 128, 128>}, {pipeline_mode = #tpu.pipeline_mode<synchronous>, transform_indices = @transform_10, window_bounds = array<i64: 1, 128>}, {pipeline_mode = #tpu.pipeline_mode<synchronous>, transform_indices = @transform_11, window_bounds = array<i64: 1, 128>}, {pipeline_mode = #tpu.pipeline_mode<synchronous>, transform_indices = @transform_12, window_bounds = array<i64: 1, 128>}, {pipeline_mode = #tpu.pipeline_mode<synchronous>, transform_indices = @transform_13, window_bounds = array<i64: 128, 128>}, {pipeline_mode = #tpu.pipeline_mode<synchronous>, transform_indices = @transform_14, window_bounds = array<i64: 1, 128>}, {pipeline_mode = #tpu.pipeline_mode<synchronous>, transform_indices = @transform_15, window_bounds = array<i64: 128, 128>}, {pipeline_mode = #tpu.pipeline_mode<synchronous>, transform_indices = @transform_16, window_bounds = array<i64: 1, 128>}]} {
    %c0 = arith.constant 0 : index
    %c0_0 = arith.constant 0 : index
    %0 = vector.load %arg1[%c0, %c0_0] : memref<16x16xbf16, #tpu.memory_space<vmem>>, vector<16x16xbf16>
    %c0_1 = arith.constant 0 : index
    %c0_2 = arith.constant 0 : index
    %1 = vector.load %arg2[%c0_1, %c0_2] : memref<16x8xf32, #tpu.memory_space<vmem>>, vector<16x8xf32>
    %c0_3 = arith.constant 0 : index
    %c0_4 = arith.constant 0 : index
    %2 = vector.load %arg3[%c0_3, %c0_4] : memref<16x8xf32, #tpu.memory_space<vmem>>, vector<16x8xf32>
    %c0_5 = arith.constant 0 : index
    %c0_6 = arith.constant 0 : index
    %3 = vector.load %arg4[%c0_5, %c0_6] : memref<8x128xbf16, #tpu.memory_space<vmem>>, vector<8x128xbf16>
    %c0_7 = arith.constant 0 : index
    %c0_8 = arith.constant 0 : index
    %4 = vector.load %arg5[%c0_7, %c0_8] : memref<1x128xf32, #tpu.memory_space<vmem>>, vector<1x128xf32>
    %c0_9 = arith.constant 0 : index
    %c0_10 = arith.constant 0 : index
    %5 = vector.load %arg6[%c0_9, %c0_10] : memref<1x128xf32, #tpu.memory_space<vmem>>, vector<1x128xf32>
    %c0_11 = arith.constant 0 : index
    %c0_12 = arith.constant 0 : index
    %6 = vector.load %arg7[%c0_11, %c0_12] : memref<1x128xf32, #tpu.memory_space<vmem>>, vector<1x128xf32>
    %c0_13 = arith.constant 0 : index
    %c0_14 = arith.constant 0 : index
    %7 = vector.load %arg8[%c0_13, %c0_14] : memref<128x128xbf16, #tpu.memory_space<vmem>>, vector<128x128xbf16>
    %c0_15 = arith.constant 0 : index
    %c0_16 = arith.constant 0 : index
    %8 = vector.load %arg9[%c0_15, %c0_16] : memref<1x128xf32, #tpu.memory_space<vmem>>, vector<1x128xf32>
    %9 = arith.truncf %1 : vector<16x8xf32> to vector<16x8xbf16>
    %cst = arith.constant dense<0.000000e+00> : vector<16x8xf32>
    %10 = tpu.matmul %0, %9, %cst {dimension_numbers = #tpu.dot_dimension_numbers<[1], [0], [0], [1], [0, 0, 1, 1], [], []>} : vector<16x16xbf16>, vector<16x8xbf16>, vector<16x8xf32> -> vector<16x8xf32>
    %11 = arith.addf %10, %1 : vector<16x8xf32>
    %12 = arith.truncf %2 : vector<16x8xf32> to vector<16x8xbf16>
    %cst_17 = arith.constant dense<0.000000e+00> : vector<16x8xf32>
    %13 = tpu.matmul %0, %12, %cst_17 {dimension_numbers = #tpu.dot_dimension_numbers<[1], [0], [0], [1], [0, 0, 1, 1], [], []>} : vector<16x16xbf16>, vector<16x8xbf16>, vector<16x8xf32> -> vector<16x8xf32>
    %14 = arith.addf %13, %2 : vector<16x8xf32>
    %15 = tpu.concatenate %11, %14 in 0 : vector<16x8xf32>, vector<16x8xf32> -> vector<32x8xf32>
    %16 = arith.truncf %15 : vector<32x8xf32> to vector<32x8xbf16>
    %cst_18 = arith.constant dense<0.000000e+00> : vector<32x128xf32>
    %17 = tpu.matmul %16, %3, %cst_18 {dimension_numbers = #tpu.dot_dimension_numbers<[1], [0], [0], [1], [0, 0, 1, 1], [], []>} : vector<32x8xbf16>, vector<8x128xbf16>, vector<32x128xf32> -> vector<32x128xf32>
    %18 = vector.broadcast %4 : vector<1x128xf32> to vector<32x128xf32>
    %19 = arith.addf %17, %18 : vector<32x128xf32>
    %20 = vector.extract_strided_slice %19 {offsets = [0, 0], sizes = [16, 128], strides = [1, 1]} : vector<32x128xf32> to vector<16x128xf32>
    %cst_19 = arith.constant dense<0.000000e+00> : vector<128xf32>
    %21 = vector.multi_reduction <add>, %20, %cst_19 [0] : vector<16x128xf32> to vector<128xf32>
    %22 = vector.shape_cast %21 : vector<128xf32> to vector<1x128xf32>
    %cst_20 = arith.constant 1.600000e+01 : f32
    %23 = vector.broadcast %cst_20 : f32 to vector<1x128xf32>
    %24 = arith.divf %22, %23 : vector<1x128xf32>
    %25 = vector.broadcast %24 : vector<1x128xf32> to vector<16x128xf32>
    %26 = arith.subf %20, %25 : vector<16x128xf32>
    %27 = arith.mulf %26, %26 : vector<16x128xf32>
    %cst_21 = arith.constant dense<0.000000e+00> : vector<128xf32>
    %28 = vector.multi_reduction <add>, %27, %cst_21 [0] : vector<16x128xf32> to vector<128xf32>
    %29 = vector.shape_cast %28 : vector<128xf32> to vector<1x128xf32>
    %cst_22 = arith.constant 1.600000e+01 : f32
    %30 = vector.broadcast %cst_22 : f32 to vector<1x128xf32>
    %31 = arith.divf %29, %30 : vector<1x128xf32>
    %32 = vector.broadcast %24 : vector<1x128xf32> to vector<16x128xf32>
    %33 = arith.subf %20, %32 : vector<16x128xf32>
    %cst_23 = arith.constant 9.99999974E-6 : f32
    %34 = vector.broadcast %cst_23 : f32 to vector<1x128xf32>
    %35 = arith.addf %31, %34 : vector<1x128xf32>
    %36 = math.rsqrt %35 : vector<1x128xf32>
    %37 = vector.broadcast %36 : vector<1x128xf32> to vector<16x128xf32>
    %38 = arith.mulf %33, %37 : vector<16x128xf32>
    %39 = vector.broadcast %5 : vector<1x128xf32> to vector<16x128xf32>
    %40 = arith.mulf %38, %39 : vector<16x128xf32>
    %41 = vector.broadcast %6 : vector<1x128xf32> to vector<16x128xf32>
    %42 = arith.addf %40, %41 : vector<16x128xf32>
    %cst_24 = arith.constant 0.000000e+00 : f32
    %43 = vector.broadcast %cst_24 : f32 to vector<16x128xf32>
    %44 = arith.maximumf %42, %43 : vector<16x128xf32>
    %45 = vector.extract_strided_slice %19 {offsets = [16, 0], sizes = [16, 128], strides = [1, 1]} : vector<32x128xf32> to vector<16x128xf32>
    %cst_25 = arith.constant dense<0.000000e+00> : vector<128xf32>
    %46 = vector.multi_reduction <add>, %45, %cst_25 [0] : vector<16x128xf32> to vector<128xf32>
    %47 = vector.shape_cast %46 : vector<128xf32> to vector<1x128xf32>
    %cst_26 = arith.constant 1.600000e+01 : f32
    %48 = vector.broadcast %cst_26 : f32 to vector<1x128xf32>
    %49 = arith.divf %47, %48 : vector<1x128xf32>
    %50 = vector.broadcast %49 : vector<1x128xf32> to vector<16x128xf32>
    %51 = arith.subf %45, %50 : vector<16x128xf32>
    %52 = arith.mulf %51, %51 : vector<16x128xf32>
    %cst_27 = arith.constant dense<0.000000e+00> : vector<128xf32>
    %53 = vector.multi_reduction <add>, %52, %cst_27 [0] : vector<16x128xf32> to vector<128xf32>
    %54 = vector.shape_cast %53 : vector<128xf32> to vector<1x128xf32>
    %cst_28 = arith.constant 1.600000e+01 : f32
    %55 = vector.broadcast %cst_28 : f32 to vector<1x128xf32>
    %56 = arith.divf %54, %55 : vector<1x128xf32>
    %57 = vector.broadcast %49 : vector<1x128xf32> to vector<16x128xf32>
    %58 = arith.subf %45, %57 : vector<16x128xf32>
    %cst_29 = arith.constant 9.99999974E-6 : f32
    %59 = vector.broadcast %cst_29 : f32 to vector<1x128xf32>
    %60 = arith.addf %56, %59 : vector<1x128xf32>
    %61 = math.rsqrt %60 : vector<1x128xf32>
    %62 = vector.broadcast %61 : vector<1x128xf32> to vector<16x128xf32>
    %63 = arith.mulf %58, %62 : vector<16x128xf32>
    %64 = vector.broadcast %5 : vector<1x128xf32> to vector<16x128xf32>
    %65 = arith.mulf %63, %64 : vector<16x128xf32>
    %66 = vector.broadcast %6 : vector<1x128xf32> to vector<16x128xf32>
    %67 = arith.addf %65, %66 : vector<16x128xf32>
    %cst_30 = arith.constant 0.000000e+00 : f32
    %68 = vector.broadcast %cst_30 : f32 to vector<16x128xf32>
    %69 = arith.maximumf %67, %68 : vector<16x128xf32>
    %70 = tpu.concatenate %44, %69 in 0 : vector<16x128xf32>, vector<16x128xf32> -> vector<32x128xf32>
    %71 = arith.truncf %70 : vector<32x128xf32> to vector<32x128xbf16>
    %cst_31 = arith.constant dense<0.000000e+00> : vector<32x128xf32>
    %72 = tpu.matmul %71, %7, %cst_31 {dimension_numbers = #tpu.dot_dimension_numbers<[1], [0], [0], [1], [0, 0, 1, 1], [], []>} : vector<32x128xbf16>, vector<128x128xbf16>, vector<32x128xf32> -> vector<32x128xf32>
    %73 = vector.broadcast %8 : vector<1x128xf32> to vector<32x128xf32>
    %74 = arith.addf %72, %73 : vector<32x128xf32>
    %cst_32 = arith.constant 0.000000e+00 : f32
    %75 = vector.broadcast %cst_32 : f32 to vector<32x128xf32>
    %76 = arith.maximumf %74, %75 : vector<32x128xf32>
    %77 = vector.extract_strided_slice %76 {offsets = [0, 0], sizes = [16, 128], strides = [1, 1]} : vector<32x128xf32> to vector<16x128xf32>
    %78 = vector.extract_strided_slice %76 {offsets = [16, 0], sizes = [16, 128], strides = [1, 1]} : vector<32x128xf32> to vector<16x128xf32>
    %c0_33 = arith.constant 0 : index
    %c0_34 = arith.constant 0 : index
    %79 = vector.load %arg10[%c0_33, %c0_34] : memref<128x128xbf16, #tpu.memory_space<vmem>>, vector<128x128xbf16>
    %c0_35 = arith.constant 0 : index
    %c0_36 = arith.constant 0 : index
    %80 = vector.load %arg11[%c0_35, %c0_36] : memref<1x128xf32, #tpu.memory_space<vmem>>, vector<1x128xf32>
    %c0_37 = arith.constant 0 : index
    %c0_38 = arith.constant 0 : index
    %81 = vector.load %arg12[%c0_37, %c0_38] : memref<1x128xf32, #tpu.memory_space<vmem>>, vector<1x128xf32>
    %c0_39 = arith.constant 0 : index
    %c0_40 = arith.constant 0 : index
    %82 = vector.load %arg13[%c0_39, %c0_40] : memref<1x128xf32, #tpu.memory_space<vmem>>, vector<1x128xf32>
    %c0_41 = arith.constant 0 : index
    %c0_42 = arith.constant 0 : index
    %83 = vector.load %arg14[%c0_41, %c0_42] : memref<128x128xbf16, #tpu.memory_space<vmem>>, vector<128x128xbf16>
    %c0_43 = arith.constant 0 : index
    %c0_44 = arith.constant 0 : index
    %84 = vector.load %arg15[%c0_43, %c0_44] : memref<1x128xf32, #tpu.memory_space<vmem>>, vector<1x128xf32>
    %85 = arith.truncf %77 : vector<16x128xf32> to vector<16x128xbf16>
    %cst_45 = arith.constant dense<0.000000e+00> : vector<16x128xf32>
    %86 = tpu.matmul %0, %85, %cst_45 {dimension_numbers = #tpu.dot_dimension_numbers<[1], [0], [0], [1], [0, 0, 1, 1], [], []>} : vector<16x16xbf16>, vector<16x128xbf16>, vector<16x128xf32> -> vector<16x128xf32>
    %87 = arith.addf %86, %77 : vector<16x128xf32>
    %88 = arith.truncf %78 : vector<16x128xf32> to vector<16x128xbf16>
    %cst_46 = arith.constant dense<0.000000e+00> : vector<16x128xf32>
    %89 = tpu.matmul %0, %88, %cst_46 {dimension_numbers = #tpu.dot_dimension_numbers<[1], [0], [0], [1], [0, 0, 1, 1], [], []>} : vector<16x16xbf16>, vector<16x128xbf16>, vector<16x128xf32> -> vector<16x128xf32>
    %90 = arith.addf %89, %78 : vector<16x128xf32>
    %91 = tpu.concatenate %87, %90 in 0 : vector<16x128xf32>, vector<16x128xf32> -> vector<32x128xf32>
    %92 = arith.truncf %91 : vector<32x128xf32> to vector<32x128xbf16>
    %cst_47 = arith.constant dense<0.000000e+00> : vector<32x128xf32>
    %93 = tpu.matmul %92, %79, %cst_47 {dimension_numbers = #tpu.dot_dimension_numbers<[1], [0], [0], [1], [0, 0, 1, 1], [], []>} : vector<32x128xbf16>, vector<128x128xbf16>, vector<32x128xf32> -> vector<32x128xf32>
    %94 = vector.broadcast %80 : vector<1x128xf32> to vector<32x128xf32>
    %95 = arith.addf %93, %94 : vector<32x128xf32>
    %96 = vector.extract_strided_slice %95 {offsets = [0, 0], sizes = [16, 128], strides = [1, 1]} : vector<32x128xf32> to vector<16x128xf32>
    %cst_48 = arith.constant dense<0.000000e+00> : vector<128xf32>
    %97 = vector.multi_reduction <add>, %96, %cst_48 [0] : vector<16x128xf32> to vector<128xf32>
    %98 = vector.shape_cast %97 : vector<128xf32> to vector<1x128xf32>
    %cst_49 = arith.constant 1.600000e+01 : f32
    %99 = vector.broadcast %cst_49 : f32 to vector<1x128xf32>
    %100 = arith.divf %98, %99 : vector<1x128xf32>
    %101 = vector.broadcast %100 : vector<1x128xf32> to vector<16x128xf32>
    %102 = arith.subf %96, %101 : vector<16x128xf32>
    %103 = arith.mulf %102, %102 : vector<16x128xf32>
    %cst_50 = arith.constant dense<0.000000e+00> : vector<128xf32>
    %104 = vector.multi_reduction <add>, %103, %cst_50 [0] : vector<16x128xf32> to vector<128xf32>
    %105 = vector.shape_cast %104 : vector<128xf32> to vector<1x128xf32>
    %cst_51 = arith.constant 1.600000e+01 : f32
    %106 = vector.broadcast %cst_51 : f32 to vector<1x128xf32>
    %107 = arith.divf %105, %106 : vector<1x128xf32>
    %108 = vector.broadcast %100 : vector<1x128xf32> to vector<16x128xf32>
    %109 = arith.subf %96, %108 : vector<16x128xf32>
    %cst_52 = arith.constant 9.99999974E-6 : f32
    %110 = vector.broadcast %cst_52 : f32 to vector<1x128xf32>
    %111 = arith.addf %107, %110 : vector<1x128xf32>
    %112 = math.rsqrt %111 : vector<1x128xf32>
    %113 = vector.broadcast %112 : vector<1x128xf32> to vector<16x128xf32>
    %114 = arith.mulf %109, %113 : vector<16x128xf32>
    %115 = vector.broadcast %81 : vector<1x128xf32> to vector<16x128xf32>
    %116 = arith.mulf %114, %115 : vector<16x128xf32>
    %117 = vector.broadcast %82 : vector<1x128xf32> to vector<16x128xf32>
    %118 = arith.addf %116, %117 : vector<16x128xf32>
    %cst_53 = arith.constant 0.000000e+00 : f32
    %119 = vector.broadcast %cst_53 : f32 to vector<16x128xf32>
    %120 = arith.maximumf %118, %119 : vector<16x128xf32>
    %121 = vector.extract_strided_slice %95 {offsets = [16, 0], sizes = [16, 128], strides = [1, 1]} : vector<32x128xf32> to vector<16x128xf32>
    %cst_54 = arith.constant dense<0.000000e+00> : vector<128xf32>
    %122 = vector.multi_reduction <add>, %121, %cst_54 [0] : vector<16x128xf32> to vector<128xf32>
    %123 = vector.shape_cast %122 : vector<128xf32> to vector<1x128xf32>
    %cst_55 = arith.constant 1.600000e+01 : f32
    %124 = vector.broadcast %cst_55 : f32 to vector<1x128xf32>
    %125 = arith.divf %123, %124 : vector<1x128xf32>
    %126 = vector.broadcast %125 : vector<1x128xf32> to vector<16x128xf32>
    %127 = arith.subf %121, %126 : vector<16x128xf32>
    %128 = arith.mulf %127, %127 : vector<16x128xf32>
    %cst_56 = arith.constant dense<0.000000e+00> : vector<128xf32>
    %129 = vector.multi_reduction <add>, %128, %cst_56 [0] : vector<16x128xf32> to vector<128xf32>
    %130 = vector.shape_cast %129 : vector<128xf32> to vector<1x128xf32>
    %cst_57 = arith.constant 1.600000e+01 : f32
    %131 = vector.broadcast %cst_57 : f32 to vector<1x128xf32>
    %132 = arith.divf %130, %131 : vector<1x128xf32>
    %133 = vector.broadcast %125 : vector<1x128xf32> to vector<16x128xf32>
    %134 = arith.subf %121, %133 : vector<16x128xf32>
    %cst_58 = arith.constant 9.99999974E-6 : f32
    %135 = vector.broadcast %cst_58 : f32 to vector<1x128xf32>
    %136 = arith.addf %132, %135 : vector<1x128xf32>
    %137 = math.rsqrt %136 : vector<1x128xf32>
    %138 = vector.broadcast %137 : vector<1x128xf32> to vector<16x128xf32>
    %139 = arith.mulf %134, %138 : vector<16x128xf32>
    %140 = vector.broadcast %81 : vector<1x128xf32> to vector<16x128xf32>
    %141 = arith.mulf %139, %140 : vector<16x128xf32>
    %142 = vector.broadcast %82 : vector<1x128xf32> to vector<16x128xf32>
    %143 = arith.addf %141, %142 : vector<16x128xf32>
    %cst_59 = arith.constant 0.000000e+00 : f32
    %144 = vector.broadcast %cst_59 : f32 to vector<16x128xf32>
    %145 = arith.maximumf %143, %144 : vector<16x128xf32>
    %146 = tpu.concatenate %120, %145 in 0 : vector<16x128xf32>, vector<16x128xf32> -> vector<32x128xf32>
    %147 = arith.truncf %146 : vector<32x128xf32> to vector<32x128xbf16>
    %cst_60 = arith.constant dense<0.000000e+00> : vector<32x128xf32>
    %148 = tpu.matmul %147, %83, %cst_60 {dimension_numbers = #tpu.dot_dimension_numbers<[1], [0], [0], [1], [0, 0, 1, 1], [], []>} : vector<32x128xbf16>, vector<128x128xbf16>, vector<32x128xf32> -> vector<32x128xf32>
    %149 = vector.broadcast %84 : vector<1x128xf32> to vector<32x128xf32>
    %150 = arith.addf %148, %149 : vector<32x128xf32>
    %cst_61 = arith.constant 0.000000e+00 : f32
    %151 = vector.broadcast %cst_61 : f32 to vector<32x128xf32>
    %152 = arith.maximumf %150, %151 : vector<32x128xf32>
    %153 = vector.extract_strided_slice %152 {offsets = [0, 0], sizes = [16, 128], strides = [1, 1]} : vector<32x128xf32> to vector<16x128xf32>
    %154 = vector.extract_strided_slice %152 {offsets = [16, 0], sizes = [16, 128], strides = [1, 1]} : vector<32x128xf32> to vector<16x128xf32>
    %cst_62 = arith.constant dense<0.000000e+00> : vector<128xf32>
    %155 = vector.multi_reduction <add>, %153, %cst_62 [0] : vector<16x128xf32> to vector<128xf32>
    %156 = vector.shape_cast %155 : vector<128xf32> to vector<1x128xf32>
    %cst_63 = arith.constant 1.600000e+01 : f32
    %157 = vector.broadcast %cst_63 : f32 to vector<1x128xf32>
    %158 = arith.divf %156, %157 : vector<1x128xf32>
    %159 = arith.negf %158 : vector<1x128xf32>
    %160 = math.exp %159 : vector<1x128xf32>
    %cst_64 = arith.constant 1.000000e+00 : f32
    %161 = vector.broadcast %cst_64 : f32 to vector<1x128xf32>
    %162 = arith.addf %161, %160 : vector<1x128xf32>
    %163 = arith.divf %161, %162 : vector<1x128xf32>
    %c0_65 = arith.constant 0 : index
    %c0_66 = arith.constant 0 : index
    %164 = vector.load %arg16[%c0_65, %c0_66] : memref<128x128xf32, #tpu.memory_space<vmem>>, vector<128x128xf32>
    %cst_67 = arith.constant dense<0.000000e+00> : vector<1x128xf32>
    %165 = tpu.matmul %163, %164, %cst_67 {dimension_numbers = #tpu.dot_dimension_numbers<[1], [0], [0], [1], [0, 0, 1, 1], [], []>} : vector<1x128xf32>, vector<128x128xf32>, vector<1x128xf32> -> vector<1x128xf32>
    %166 = vector.broadcast %165 : vector<1x128xf32> to vector<16x128xf32>
    %167 = arith.mulf %153, %166 : vector<16x128xf32>
    %cst_68 = arith.constant dense<0.000000e+00> : vector<16xf32>
    %168 = vector.multi_reduction <add>, %167, %cst_68 [1] : vector<16x128xf32> to vector<16xf32>
    %169 = vector.shape_cast %168 : vector<16xf32> to vector<16x1xf32>
    %170 = arith.negf %169 : vector<16x1xf32>
    %171 = math.exp %170 : vector<16x1xf32>
    %cst_69 = arith.constant 1.000000e+00 : f32
    %172 = vector.broadcast %cst_69 : f32 to vector<16x1xf32>
    %173 = arith.addf %172, %171 : vector<16x1xf32>
    %174 = arith.divf %172, %173 : vector<16x1xf32>
    %175 = vector.broadcast %165 : vector<1x128xf32> to vector<16x128xf32>
    %176 = arith.mulf %154, %175 : vector<16x128xf32>
    %cst_70 = arith.constant dense<0.000000e+00> : vector<16xf32>
    %177 = vector.multi_reduction <add>, %176, %cst_70 [1] : vector<16x128xf32> to vector<16xf32>
    %178 = vector.shape_cast %177 : vector<16xf32> to vector<16x1xf32>
    %179 = arith.negf %178 : vector<16x1xf32>
    %180 = math.exp %179 : vector<16x1xf32>
    %cst_71 = arith.constant 1.000000e+00 : f32
    %181 = vector.broadcast %cst_71 : f32 to vector<16x1xf32>
    %182 = arith.addf %181, %180 : vector<16x1xf32>
    %183 = arith.divf %181, %182 : vector<16x1xf32>
    %184 = math.log %174 : vector<16x1xf32>
    %cst_72 = arith.constant -1.000000e+02 : f32
    %185 = vector.broadcast %cst_72 : f32 to vector<16x1xf32>
    %186 = arith.maximumf %184, %185 : vector<16x1xf32>
    %cst_73 = arith.constant 0.000000e+00 : f32
    %187 = vector.broadcast %cst_73 : f32 to vector<16x1xf32>
    %188 = arith.subf %187, %186 : vector<16x1xf32>
    %cst_74 = arith.constant 1.000000e+00 : f32
    %189 = vector.broadcast %cst_74 : f32 to vector<16x1xf32>
    %190 = arith.subf %189, %183 : vector<16x1xf32>
    %191 = math.log %190 : vector<16x1xf32>
    %cst_75 = arith.constant -1.000000e+02 : f32
    %192 = vector.broadcast %cst_75 : f32 to vector<16x1xf32>
    %193 = arith.maximumf %191, %192 : vector<16x1xf32>
    %194 = arith.subf %188, %193 : vector<16x1xf32>
    %195 = vector.shape_cast %194 : vector<16x1xf32> to vector<1x16x1xf32>
    %cst_76 = arith.constant dense<0.000000e+00> : vector<1xf32>
    %196 = vector.multi_reduction <add>, %195, %cst_76 [1, 2] : vector<1x16x1xf32> to vector<1xf32>
    %197 = vector.shape_cast %196 : vector<1xf32> to vector<1x1x1xf32>
    %198 = vector.extract %197[0, 0, 0] : f32 from vector<1x1x1xf32>
    %cst_77 = arith.constant 3.200000e+01 : f32
    %199 = arith.divf %198, %cst_77 : f32
    %200 = vector.broadcast %199 : f32 to vector<1x128xf32>
    %c0_78 = arith.constant 0 : index
    %c0_79 = arith.constant 0 : index
    %201 = vector.load %arg17[%c0_78, %c0_79] : memref<1x128xf32, #tpu.memory_space<vmem>>, vector<1x128xf32>
    tpu.vector_store %arg17[%c0_78, %c0_79], %200 {strides = array<i32>} : memref<1x128xf32, #tpu.memory_space<vmem>>, vector<1x128xf32>,
    return
  }
  func.func @transform_0(%arg0: i32) -> (i32, i32) {
    %c0_i32 = arith.constant 0 : i32
    %c0_i32_0 = arith.constant 0 : i32
    %c0_i32_1 = arith.constant 0 : i32
    return %c0_i32, %c0_i32_0 : i32, i32
  }
  func.func @transform_1(%arg0: i32) -> (i32, i32) {
    %c0_i32 = arith.constant 0 : i32
    %c0_i32_0 = arith.constant 0 : i32
    %c0_i32_1 = arith.constant 0 : i32
    return %c0_i32, %c0_i32_0 : i32, i32
  }
  func.func @transform_2(%arg0: i32) -> (i32, i32) {
    %c0_i32 = arith.constant 0 : i32
    %c0_i32_0 = arith.constant 0 : i32
    %c0_i32_1 = arith.constant 0 : i32
    return %c0_i32, %c0_i32_0 : i32, i32
  }
  func.func @transform_3(%arg0: i32) -> (i32, i32) {
    %c0_i32 = arith.constant 0 : i32
    %c0_i32_0 = arith.constant 0 : i32
    %c0_i32_1 = arith.constant 0 : i32
    return %c0_i32, %c0_i32_0 : i32, i32
  }
  func.func @transform_4(%arg0: i32) -> (i32, i32) {
    %c0_i32 = arith.constant 0 : i32
    %c0_i32_0 = arith.constant 0 : i32
    %c0_i32_1 = arith.constant 0 : i32
    return %c0_i32, %c0_i32_0 : i32, i32
  }
  func.func @transform_5(%arg0: i32) -> (i32, i32) {
    %c0_i32 = arith.constant 0 : i32
    %c0_i32_0 = arith.constant 0 : i32
    %c0_i32_1 = arith.constant 0 : i32
    return %c0_i32, %c0_i32_0 : i32, i32
  }
  func.func @transform_6(%arg0: i32) -> (i32, i32) {
    %c0_i32 = arith.constant 0 : i32
    %c0_i32_0 = arith.constant 0 : i32
    %c0_i32_1 = arith.constant 0 : i32
    return %c0_i32, %c0_i32_0 : i32, i32
  }
  func.func @transform_7(%arg0: i32) -> (i32, i32) {
    %c0_i32 = arith.constant 0 : i32
    %c0_i32_0 = arith.constant 0 : i32
    %c0_i32_1 = arith.constant 0 : i32
    return %c0_i32, %c0_i32_0 : i32, i32
  }
  func.func @transform_8(%arg0: i32) -> (i32, i32) {
    %c0_i32 = arith.constant 0 : i32
    %c0_i32_0 = arith.constant 0 : i32
    %c0_i32_1 = arith.constant 0 : i32
    return %c0_i32, %c0_i32_0 : i32, i32
  }
  func.func @transform_9(%arg0: i32) -> (i32, i32) {
    %c0_i32 = arith.constant 0 : i32
    %c0_i32_0 = arith.constant 0 : i32
    %c0_i32_1 = arith.constant 0 : i32
    return %c0_i32, %c0_i32_0 : i32, i32
  }
  func.func @transform_10(%arg0: i32) -> (i32, i32) {
    %c0_i32 = arith.constant 0 : i32
    %c0_i32_0 = arith.constant 0 : i32
    %c0_i32_1 = arith.constant 0 : i32
    return %c0_i32, %c0_i32_0 : i32, i32
  }
  func.func @transform_11(%arg0: i32) -> (i32, i32) {
    %c0_i32 = arith.constant 0 : i32
    %c0_i32_0 = arith.constant 0 : i32
    %c0_i32_1 = arith.constant 0 : i32
    return %c0_i32, %c0_i32_0 : i32, i32
  }
  func.func @transform_12(%arg0: i32) -> (i32, i32) {
    %c0_i32 = arith.constant 0 : i32
    %c0_i32_0 = arith.constant 0 : i32
    %c0_i32_1 = arith.constant 0 : i32
    return %c0_i32, %c0_i32_0 : i32, i32
  }
  func.func @transform_13(%arg0: i32) -> (i32, i32) {
    %c0_i32 = arith.constant 0 : i32
    %c0_i32_0 = arith.constant 0 : i32
    %c0_i32_1 = arith.constant 0 : i32
    return %c0_i32, %c0_i32_0 : i32, i32
  }
  func.func @transform_14(%arg0: i32) -> (i32, i32) {
    %c0_i32 = arith.constant 0 : i32
    %c0_i32_0 = arith.constant 0 : i32
    %c0_i32_1 = arith.constant 0 : i32
    return %c0_i32, %c0_i32_0 : i32, i32
  }
  func.func @transform_15(%arg0: i32) -> (i32, i32) {
    %c0_i32 = arith.constant 0 : i32
    %c0_i32_0 = arith.constant 0 : i32
    %c0_i32_1 = arith.constant 0 : i32
    return %c0_i32, %c0_i32_0 : i32, i32
  }
  func.func @transform_16(%arg0: i32) -> (i32, i32) {
    %c0_i32 = arith.constant 0 : i32
    %c0_i32_0 = arith.constant 0 : i32
    %c0_i32_1 = arith.constant 0 : i32
    return %c0_i32, %c0_i32_0 : i32, i32
  }
}

</mosaic_0001>

<bundles_post_ra>
// kernel: inspection_l_forward.1
= control target key start
LH: loop header
LB: loop body
LE: loop exit
PB: predicated region body
PF: predicated region fallthrough
CT: control target
= control target key end

     0   :  { %s2320_s0 = inlined_call_operand.hbm [shape: bf16[16,16], index: 0, kind: input, shape index: {}]   ;;  %s2321_s1 = inlined_call_operand.hbm [shape: f32[16,8], index: 1, kind: input, shape index: {}]   ;;  %s2322_s2 = inlined_call_operand.hbm [shape: f32[16,8], index: 2, kind: input, shape index: {}]   ;;  %s2323_s3 = inlined_call_operand.hbm [shape: bf16[8,128], index: 3, kind: input, shape index: {}]   ;;  %s2324_s4 = inlined_call_operand.hbm [shape: f32[1,128], index: 4, kind: input, shape index: {}]   ;;  %s2325_s5 = inlined_call_operand.hbm [shape: f32[1,128], index: 5, kind: input, shape index: {}]   ;;  %s2326_s6 = inlined_call_operand.hbm [shape: f32[1,128], index: 6, kind: input, shape index: {}]   ;;  %s2327_s7 = inlined_call_operand.hbm [shape: bf16[128,128], index: 7, kind: input, shape index: {}]   ;;  %s2328_s8 = inlined_call_operand.hbm [shape: f32[1,128], index: 8, kind: input, shape index: {}]   ;;  %s2329_s9 = inlined_call_operand.hbm [shape: bf16[128,128], index: 9, kind: input, shape index: {}]   ;;  %s2330_s10 = inlined_call_operand.hbm [shape: f32[1,128], index: 10, kind: input, shape index: {}]   ;;  %s2331_s11 = inlined_call_operand.hbm [shape: f32[1,128], index: 11, kind: input, shape index: {}]   ;;  %s2332_s12 = inlined_call_operand.hbm [shape: f32[1,128], index: 12, kind: input, shape index: {}]   ;;  %s2333_s13 = inlined_call_operand.hbm [shape: bf16[128,128], index: 13, kind: input, shape index: {}]   ;;  %s2334_s14 = inlined_call_operand.hbm [shape: f32[1,128], index: 14, kind: input, shape index: {}]   ;;  %s2335_s15 = inlined_call_operand.hbm [shape: f32[128,128], index: 15, kind: input, shape index: {}]   ;;  %s2336_s16 = inlined_call_operand.hbm [shape: f32[1,128], index: 16, kind: output, shape index: {}]  }
   0x1   :  { %2339 = sst [smem:[#allocation39_spill]] %s2320_s0 }
   0x2   :  { %2340 = sst [smem:[#allocation40_spill]] %s2336_s16 }
   0x3   :  { %21 = vsyncpa [#allocation3], 0 }
   0x4   :  { %22 = vsyncpa [#allocation6], 0 }
   0x5   :  { %23 = vsyncpa [#allocation9], 0 }
   0x6   :  { %24 = vsyncpa [#allocation12], 0 }
   0x7   :  { %25 = vsyncpa [#allocation15], 0 }
   0x8   :  { %26 = vsyncpa [#allocation18], 0 }
   0x9   :  { %27 = vsyncpa [#allocation21], 0 }
   0xa   :  { %28 = vsyncpa [#allocation24], 0 }
   0xb   :  { %29 = vsyncpa [#allocation27], 0 }
   0xc   :  { %30 = vsyncpa [#allocation4], 0  ;;  %s1962_s21 = smov [#allocation5]   ;;  %s1568_s25 = scalar_lea.hbm %s2321_s1, 256 }
   0xd   :  { %s48_s22 = sshll.u32 %s1962_s21, 4  ;;  %p1569_p0 = scmp.ne.s32.totalorder %s2321_s1, %s1568_s25  ;;  %s49_s22 = int_to_ptr.vmem [resolvable:$true] %s48_s22 }
   0xe   :  { %p1572_p1 = scmp.lt.u32.totalorder %s1568_s25, %s2321_s1 }
  0x10   :  { %p1574_p2 = pnand %p1572_p1, %p1569_p0 }
  0x12   :  { %1577 = shalt.err (!%p1574_p2)
}
  0x13   :  { %s1578_s30 = scalar_lea.vmem %s49_s22, 256  ;;  %p1583_p4 = scmp.lt.s32.totalorder %s49_s22, %s49_s22 }
  0x14   :  { %p1579_p3 = scmp.ne.s32.totalorder %s49_s22, %s1578_s30  ;;  %p1584_p5 = scmp.lt.s32.totalorder %s1578_s30, %s1578_s30 }
  0x16   :  { %p1585_p6 = por %p1584_p5, %p1583_p4 }
  0x18   :  { %p1586_p7 = pnand %p1585_p6, %p1579_p3 }
  0x1a   :  { %1589 = shalt.err (!%p1586_p7)
}
  0x1b   :  { %s1963_s0 = smov 128   ;;  %s1964_s17 = smov 8  }
  0x1c   :  { %54 = dma.hbm_to_vmem [thread:$0]  %s2321_s1, 256, %s49_s22, [#allocation6], %s1963_s0, %s1963_s0, %s1964_s17  }
  0x1d   :  { %s1965_s20 = smov [#allocation8]   ;;  %s1966_s23 = smov [#allocation11]  }
  0x1e   :  { %s73_s21 = sshll.u32 %s1965_s20, 4  ;;  %s93_s24 = sshll.u32 %s1966_s23, 4  ;;  %s74_s21 = int_to_ptr.vmem [resolvable:$true] %s73_s21  ;;  %s94_s24 = int_to_ptr.vmem [resolvable:$true] %s93_s24 }
  0x1f   :  { %s1590_s27 = scalar_lea.hbm %s2323_s3, 64 }
  0x20   :  { %p1591_p8 = scmp.ne.s32.totalorder %s2323_s3, %s1590_s27  ;;  %p1594_p9 = scmp.lt.u32.totalorder %s1590_s27, %s2323_s3 }
  0x22   :  { %p1596_p10 = pnand %p1594_p9, %p1591_p8 }
  0x24   :  { %1599 = shalt.err (!%p1596_p10)
}
  0x25   :  { %s1600_s1 = scalar_lea.vmem %s74_s21, 64  ;;  %p1605_p12 = scmp.lt.s32.totalorder %s74_s21, %s74_s21 }
  0x26   :  { %p1601_p11 = scmp.ne.s32.totalorder %s74_s21, %s1600_s1  ;;  %p1606_p13 = scmp.lt.s32.totalorder %s1600_s1, %s1600_s1 }
  0x28   :  { %p1607_p0 = por %p1606_p13, %p1605_p12 }
  0x2a   :  { %p1608_p1 = pnand %p1607_p0, %p1601_p11 }
  0x2c   :  { %1611 = shalt.err (!%p1608_p1)
}
  0x2d   :  { %76 = dma.hbm_to_vmem [thread:$0]  %s2323_s3, 64, %s74_s21, [#allocation9]  }
  0x2e   :  { %s1612_s23 = scalar_lea.hbm %s2325_s5, 16 }
  0x2f   :  { %p1613_p2 = scmp.ne.s32.totalorder %s2325_s5, %s1612_s23  ;;  %p1616_p3 = scmp.lt.u32.totalorder %s1612_s23, %s2325_s5 }
  0x31   :  { %p1618_p4 = pnand %p1616_p3, %p1613_p2 }
  0x33   :  { %1621 = shalt.err (!%p1618_p4)
}
  0x34   :  { %s1622_s28 = scalar_lea.vmem %s94_s24, 16  ;;  %s1626_s29 = scalar_lea.vmem %s94_s24, 32 }
  0x35   :  { %p1623_p5 = scmp.ne.s32.totalorder %s94_s24, %s1622_s28  ;;  %p1627_p6 = scmp.lt.s32.totalorder %s94_s24, %s94_s24 }
  0x36   :  { %p1628_p7 = scmp.lt.s32.totalorder %s1626_s29, %s1622_s28 }
  0x38   :  { %p1629_p8 = por %p1628_p7, %p1627_p6 }
  0x3a   :  { %p1630_p9 = pnand %p1629_p8, %p1623_p5 }
  0x3c   :  { %1633 = shalt.err (!%p1630_p9)
}
  0x3d   :  { %96 = dma.hbm_to_vmem [thread:$0]  %s2325_s5, 16, %s94_s24, [#allocation12]  }
  0x3e   :  { %s1967_s30 = smov [#allocation14]   ;;  %s1968_s22 = smov [#allocation17]  }
  0x3f   :  { %s112_s1 = sshll.u32 %s1967_s30, 4  ;;  %s134_s18 = sshll.u32 %s1968_s22, 4  ;;  %s113_s1 = int_to_ptr.vmem [resolvable:$true] %s112_s1  ;;  %s135_s18 = int_to_ptr.vmem [resolvable:$true] %s134_s18 }
  0x40   :  { %s1634_s23 = scalar_lea.hbm %s2327_s7, 1024 }
  0x41   :  { %p1635_p10 = scmp.ne.s32.totalorder %s2327_s7, %s1634_s23  ;;  %p1638_p11 = scmp.lt.u32.totalorder %s1634_s23, %s2327_s7 }
  0x43   :  { %p1640_p12 = pnand %p1638_p11, %p1635_p10 }
  0x45   :  { %1643 = shalt.err (!%p1640_p12)
}
  0x46   :  { %s1644_s5 = scalar_lea.vmem %s113_s1, 1024  ;;  %p1649_p0 = scmp.lt.s32.totalorder %s113_s1, %s113_s1 }
  0x47   :  { %p1645_p13 = scmp.ne.s32.totalorder %s113_s1, %s1644_s5  ;;  %p1650_p1 = scmp.lt.s32.totalorder %s1644_s5, %s1644_s5 }
  0x49   :  { %p1651_p2 = por %p1650_p1, %p1649_p0 }
  0x4b   :  { %p1652_p3 = pnand %p1651_p2, %p1645_p13 }
  0x4d   :  { %1655 = shalt.err (!%p1652_p3)
}
  0x4e   :  { %s1969_s24 = smov 64   ;;  %s1970_s28 = smov 4  }
  0x4f   :  { %118 = dma.hbm_to_vmem [thread:$0]  %s2327_s7, 1024, %s113_s1, [#allocation15], %s1969_s24, %s1969_s24, %s1970_s28  }
  0x50   :  { %s1656_s22 = scalar_lea.hbm %s2329_s9, 1024 }
  0x51   :  { %p1657_p4 = scmp.ne.s32.totalorder %s2329_s9, %s1656_s22  ;;  %p1660_p5 = scmp.lt.u32.totalorder %s1656_s22, %s2329_s9 }
  0x53   :  { %p1662_p6 = pnand %p1660_p5, %p1657_p4 }
  0x55   :  { %1665 = shalt.err (!%p1662_p6)
}
  0x56   :  { %s1666_s25 = scalar_lea.vmem %s135_s18, 1024  ;;  %p1671_p8 = scmp.lt.s32.totalorder %s135_s18, %s135_s18 }
  0x57   :  { %p1667_p7 = scmp.ne.s32.totalorder %s135_s18, %s1666_s25  ;;  %p1672_p9 = scmp.lt.s32.totalorder %s1666_s25, %s1666_s25 }
  0x59   :  { %p1673_p10 = por %p1672_p9, %p1671_p8 }
  0x5b   :  { %p1674_p11 = pnand %p1673_p10, %p1667_p7 }
  0x5d   :  { %1677 = shalt.err (!%p1674_p11)
}
  0x5e   :  { %140 = dma.hbm_to_vmem [thread:$0]  %s2329_s9, 1024, %s135_s18, [#allocation18], %s1969_s24, %s1969_s24, %s1970_s28  }
  0x5f   :  { %s1971_s26 = smov [#allocation20]   ;;  %s1972_s5 = smov [#allocation23]  }
  0x60   :  { %s157_s27 = sshll.u32 %s1971_s26, 4  ;;  %s176_s29 = sshll.u32 %s1972_s5, 4  ;;  %s158_s27 = int_to_ptr.vmem [resolvable:$true] %s157_s27  ;;  %s177_s29 = int_to_ptr.vmem [resolvable:$true] %s176_s29 }
  0x61   :  { %s1678_s30 = scalar_lea.hbm %s2331_s11, 16 }
  0x62   :  { %p1679_p12 = scmp.ne.s32.totalorder %s2331_s11, %s1678_s30  ;;  %p1682_p13 = scmp.lt.u32.totalorder %s1678_s30, %s2331_s11 }
  0x64   :  { %p1684_p0 = pnand %p1682_p13, %p1679_p12 }
  0x66   :  { %1687 = shalt.err (!%p1684_p0)
}
  0x67   :  { %s1688_s9 = scalar_lea.vmem %s158_s27, 16  ;;  %s1692_s18 = scalar_lea.vmem %s158_s27, 32 }
  0x68   :  { %p1689_p1 = scmp.ne.s32.totalorder %s158_s27, %s1688_s9  ;;  %p1693_p2 = scmp.lt.s32.totalorder %s158_s27, %s158_s27 }
  0x69   :  { %p1694_p3 = scmp.lt.s32.totalorder %s1692_s18, %s1688_s9 }
  0x6b   :  { %p1695_p4 = por %p1694_p3, %p1693_p2 }
  0x6d   :  { %p1696_p5 = pnand %p1695_p4, %p1689_p1 }
  0x6f   :  { %1699 = shalt.err (!%p1696_p5)
}
  0x70   :  { %160 = dma.hbm_to_vmem [thread:$0]  %s2331_s11, 16, %s158_s27, [#allocation21]  }
  0x71   :  { %s1700_s26 = scalar_lea.hbm %s2333_s13, 1024 }
  0x72   :  { %p1701_p6 = scmp.ne.s32.totalorder %s2333_s13, %s1700_s26  ;;  %p1704_p7 = scmp.lt.u32.totalorder %s1700_s26, %s2333_s13 }
  0x74   :  { %p1706_p8 = pnand %p1704_p7, %p1701_p6 }
  0x76   :  { %1709 = shalt.err (!%p1706_p8)
}
  0x77   :  { %s1710_s22 = scalar_lea.vmem %s177_s29, 1024  ;;  %p1715_p10 = scmp.lt.s32.totalorder %s177_s29, %s177_s29 }
  0x78   :  { %p1711_p9 = scmp.ne.s32.totalorder %s177_s29, %s1710_s22  ;;  %p1716_p11 = scmp.lt.s32.totalorder %s1710_s22, %s1710_s22 }
  0x7a   :  { %p1717_p12 = por %p1716_p11, %p1715_p10 }
  0x7c   :  { %p1718_p13 = pnand %p1717_p12, %p1711_p9 }
  0x7e   :  { %1721 = shalt.err (!%p1718_p13)
}
  0x7f   :  { %182 = dma.hbm_to_vmem [thread:$0]  %s2333_s13, 1024, %s177_s29, [#allocation24], %s1969_s24, %s1969_s24, %s1970_s28  }
  0x80   :  { %s1973_s19 = smov [#allocation2]   ;;  %s1974_s23 = smov [#allocation7]  }
  0x81   :  { %s36_s20 = sshll.u32 %s1973_s19, 4  ;;  %s60_s9 = sshll.u32 %s1974_s23, 4  ;;  %s37_s20 = int_to_ptr.vmem [resolvable:$true] %s36_s20  ;;  %s61_s9 = int_to_ptr.vmem [resolvable:$true] %s60_s9 }
  0x82   :  { %s2341_s25 = sld [smem:[#allocation39_spill]] }
  0x88   :  { %s1722_s7 = scalar_lea.hbm %s2341_s25, 128 }
  0x89   :  { %p1723_p0 = scmp.ne.s32.totalorder %s2341_s25, %s1722_s7  ;;  %p1726_p1 = scmp.lt.u32.totalorder %s1722_s7, %s2341_s25 }
  0x8b   :  { %p1728_p2 = pnand %p1726_p1, %p1723_p0 }
  0x8d   :  { %1731 = shalt.err (!%p1728_p2)
}
  0x8e   :  { %s1732_s13 = scalar_lea.vmem %s37_s20, 128  ;;  %p1737_p4 = scmp.lt.s32.totalorder %s37_s20, %s37_s20 }
  0x8f   :  { %p1733_p3 = scmp.ne.s32.totalorder %s37_s20, %s1732_s13  ;;  %p1738_p5 = scmp.lt.s32.totalorder %s1732_s13, %s1732_s13 }
  0x91   :  { %p1739_p6 = por %p1738_p5, %p1737_p4 }
  0x93   :  { %p1740_p7 = pnand %p1739_p6, %p1733_p3 }
  0x95   :  { %1743 = shalt.err (!%p1740_p7)
}
  0x96   :  { %42 = dma.hbm_to_vmem [thread:$0]  %s2341_s25, 128, %s37_s20, [#allocation3], %s1969_s24, %s1969_s24, %s1970_s28  }
  0x97   :  { %s1744_s11 = scalar_lea.hbm %s2322_s2, 256 }
  0x98   :  { %p1745_p8 = scmp.ne.s32.totalorder %s2322_s2, %s1744_s11  ;;  %p1748_p9 = scmp.lt.u32.totalorder %s1744_s11, %s2322_s2 }
  0x9a   :  { %p1750_p10 = pnand %p1748_p9, %p1745_p8 }
  0x9c   :  { %1753 = shalt.err (!%p1750_p10)
}
  0x9d   :  { %s1754_s16 = scalar_lea.vmem %s61_s9, 256  ;;  %p1759_p12 = scmp.lt.s32.totalorder %s61_s9, %s61_s9 }
  0x9e   :  { %p1755_p11 = scmp.ne.s32.totalorder %s61_s9, %s1754_s16  ;;  %p1760_p13 = scmp.lt.s32.totalorder %s1754_s16, %s1754_s16 }
  0xa0   :  { %p1761_p0 = por %p1760_p13, %p1759_p12 }
  0xa2   :  { %p1762_p1 = pnand %p1761_p0, %p1755_p11 }
  0xa4   :  { %1765 = shalt.err (!%p1762_p1)
}
  0xa5   :  { %66 = dma.hbm_to_vmem [thread:$0]  %s2322_s2, 256, %s61_s9, [#allocation6], %s1963_s0, %s1963_s0, %s1964_s17  }
  0xa6   :  { %s1975_s20 = smov [#allocation10]   ;;  %s1976_s7 = smov [#allocation13]  }
  0xa7   :  { %s83_s25 = sshll.u32 %s1975_s20, 4  ;;  %s103_s1 = sshll.u32 %s1976_s7, 4  ;;  %s84_s25 = int_to_ptr.vmem [resolvable:$true] %s83_s25  ;;  %s104_s1 = int_to_ptr.vmem [resolvable:$true] %s103_s1 }
  0xa8   :  { %s1766_s3 = scalar_lea.hbm %s2324_s4, 16 }
  0xa9   :  { %p1767_p2 = scmp.ne.s32.totalorder %s2324_s4, %s1766_s3  ;;  %p1770_p3 = scmp.lt.u32.totalorder %s1766_s3, %s2324_s4 }
  0xab   :  { %p1772_p4 = pnand %p1770_p3, %p1767_p2 }
  0xad   :  { %1775 = shalt.err (!%p1772_p4)
}
  0xae   :  { %s1776_s2 = scalar_lea.vmem %s84_s25, 16  ;;  %s1780_s9 = scalar_lea.vmem %s84_s25, 32 }
  0xaf   :  { %p1777_p5 = scmp.ne.s32.totalorder %s84_s25, %s1776_s2  ;;  %p1781_p6 = scmp.lt.s32.totalorder %s84_s25, %s84_s25 }
  0xb0   :  { %p1782_p7 = scmp.lt.s32.totalorder %s1780_s9, %s1776_s2 }
  0xb2   :  { %p1783_p8 = por %p1782_p7, %p1781_p6 }
  0xb4   :  { %p1784_p9 = pnand %p1783_p8, %p1777_p5 }
  0xb6   :  { %1787 = shalt.err (!%p1784_p9)
}
  0xb7   :  { %86 = dma.hbm_to_vmem [thread:$0]  %s2324_s4, 16, %s84_s25, [#allocation9]  }
  0xb8   :  { %s1788_s23 = scalar_lea.hbm %s2326_s6, 16 }
  0xb9   :  { %p1789_p10 = scmp.ne.s32.totalorder %s2326_s6, %s1788_s23  ;;  %p1792_p11 = scmp.lt.u32.totalorder %s1788_s23, %s2326_s6 }
  0xbb   :  { %p1794_p12 = pnand %p1792_p11, %p1789_p10 }
  0xbd   :  { %1797 = shalt.err (!%p1794_p12)
}
  0xbe   :  { %s1798_s20 = scalar_lea.vmem %s104_s1, 16  ;;  %s1802_s7 = scalar_lea.vmem %s104_s1, 32 }
  0xbf   :  { %p1799_p13 = scmp.ne.s32.totalorder %s104_s1, %s1798_s20  ;;  %p1803_p0 = scmp.lt.s32.totalorder %s104_s1, %s104_s1 }
  0xc0   :  { %p1804_p1 = scmp.lt.s32.totalorder %s1802_s7, %s1798_s20 }
  0xc2   :  { %p1805_p2 = por %p1804_p1, %p1803_p0 }
  0xc4   :  { %p1806_p3 = pnand %p1805_p2, %p1799_p13 }
  0xc6   :  { %1809 = shalt.err (!%p1806_p3)
}
  0xc7   :  { %106 = dma.hbm_to_vmem [thread:$0]  %s2326_s6, 16, %s104_s1, [#allocation12]  }
  0xc8   :  { %s1977_s26 = smov [#allocation16]   ;;  %s1978_s3 = smov [#allocation19]  }
  0xc9   :  { %s125_s5 = sshll.u32 %s1977_s26, 4  ;;  %s147_s13 = sshll.u32 %s1978_s3, 4  ;;  %s126_s5 = int_to_ptr.vmem [resolvable:$true] %s125_s5  ;;  %s148_s13 = int_to_ptr.vmem [resolvable:$true] %s147_s13 }
  0xca   :  { %s1810_s30 = scalar_lea.hbm %s2328_s8, 16 }
  0xcb   :  { %p1811_p4 = scmp.ne.s32.totalorder %s2328_s8, %s1810_s30  ;;  %p1814_p5 = scmp.lt.u32.totalorder %s1810_s30, %s2328_s8 }
  0xcd   :  { %p1816_p6 = pnand %p1814_p5, %p1811_p4 }
  0xcf   :  { %1819 = shalt.err (!%p1816_p6)
}
  0xd0   :  { %s1820_s6 = scalar_lea.vmem %s126_s5, 16  ;;  %s1824_s1 = scalar_lea.vmem %s126_s5, 32 }
  0xd1   :  { %p1821_p7 = scmp.ne.s32.totalorder %s126_s5, %s1820_s6  ;;  %p1825_p8 = scmp.lt.s32.totalorder %s126_s5, %s126_s5 }
  0xd2   :  { %p1826_p9 = scmp.lt.s32.totalorder %s1824_s1, %s1820_s6 }
  0xd4   :  { %p1827_p10 = por %p1826_p9, %p1825_p8 }
  0xd6   :  { %p1828_p11 = pnand %p1827_p10, %p1821_p7 }
  0xd8   :  { %1831 = shalt.err (!%p1828_p11)
}
  0xd9   :  { %128 = dma.hbm_to_vmem [thread:$0]  %s2328_s8, 16, %s126_s5, [#allocation15]  }
  0xda   :  { %s1832_s16 = scalar_lea.hbm %s2330_s10, 16 }
  0xdb   :  { %p1833_p12 = scmp.ne.s32.totalorder %s2330_s10, %s1832_s16  ;;  %p1836_p13 = scmp.lt.u32.totalorder %s1832_s16, %s2330_s10 }
  0xdd   :  { %p1838_p0 = pnand %p1836_p13, %p1833_p12 }
  0xdf   :  { %1841 = shalt.err (!%p1838_p0)
}
  0xe0   :  { %s1842_s4 = scalar_lea.vmem %s148_s13, 16  ;;  %s1846_s25 = scalar_lea.vmem %s148_s13, 32 }
  0xe1   :  { %p1843_p1 = scmp.ne.s32.totalorder %s148_s13, %s1842_s4  ;;  %p1847_p2 = scmp.lt.s32.totalorder %s148_s13, %s148_s13 }
  0xe2   :  { %p1848_p3 = scmp.lt.s32.totalorder %s1846_s25, %s1842_s4 }
  0xe4   :  { %p1849_p4 = por %p1848_p3, %p1847_p2 }
  0xe6   :  { %p1850_p5 = pnand %p1849_p4, %p1843_p1 }
  0xe8   :  { %1853 = shalt.err (!%p1850_p5)
}
  0xe9   :  { %150 = dma.hbm_to_vmem [thread:$0]  %s2330_s10, 16, %s148_s13, [#allocation18]  }
  0xea   :  { %s1979_s5 = smov [#allocation22]   ;;  %s1980_s29 = smov [#allocation25]  }
  0xeb   :  { %s167_s3 = sshll.u32 %s1979_s5, 4  ;;  %s189_s21 = sshll.u32 %s1980_s29, 4  ;;  %s168_s3 = int_to_ptr.vmem [resolvable:$true] %s167_s3  ;;  %s190_s21 = int_to_ptr.vmem [resolvable:$true] %s189_s21 }
  0xec   :  { %s1854_s9 = scalar_lea.hbm %s2332_s12, 16 }
  0xed   :  { %p1855_p6 = scmp.ne.s32.totalorder %s2332_s12, %s1854_s9  ;;  %p1858_p7 = scmp.lt.u32.totalorder %s1854_s9, %s2332_s12 }
  0xef   :  { %p1860_p8 = pnand %p1858_p7, %p1855_p6 }
  0xf1   :  { %1863 = shalt.err (!%p1860_p8)
}
  0xf2   :  { %s1864_s10 = scalar_lea.vmem %s168_s3, 16  ;;  %s1868_s13 = scalar_lea.vmem %s168_s3, 32 }
  0xf3   :  { %p1865_p9 = scmp.ne.s32.totalorder %s168_s3, %s1864_s10  ;;  %p1869_p10 = scmp.lt.s32.totalorder %s168_s3, %s168_s3 }
  0xf4   :  { %p1870_p11 = scmp.lt.s32.totalorder %s1868_s13, %s1864_s10 }
  0xf6   :  { %p1871_p12 = por %p1870_p11, %p1869_p10 }
  0xf8   :  { %p1872_p13 = pnand %p1871_p12, %p1865_p9 }
  0xfa   :  { %1875 = shalt.err (!%p1872_p13)
}
  0xfb   :  { %170 = dma.hbm_to_vmem [thread:$0]  %s2332_s12, 16, %s168_s3, [#allocation21]  }
  0xfc   :  { %s1876_s16 = scalar_lea.hbm %s2334_s14, 16 }
  0xfd   :  { %p1877_p0 = scmp.ne.s32.totalorder %s2334_s14, %s1876_s16  ;;  %p1880_p1 = scmp.lt.u32.totalorder %s1876_s16, %s2334_s14 }
  0xff   :  { %p1882_p2 = pnand %p1880_p1, %p1877_p0 }
 0x101   :  { %1885 = shalt.err (!%p1882_p2)
}
 0x102   :  { %s1886_s4 = scalar_lea.vmem %s190_s21, 16  ;;  %s1890_s25 = scalar_lea.vmem %s190_s21, 32 }
 0x103   :  { %p1887_p3 = scmp.ne.s32.totalorder %s190_s21, %s1886_s4  ;;  %p1891_p4 = scmp.lt.s32.totalorder %s190_s21, %s190_s21 }
 0x104   :  { %p1892_p5 = scmp.lt.s32.totalorder %s1890_s25, %s1886_s4 }
 0x106   :  { %p1893_p6 = por %p1892_p5, %p1891_p4 }
 0x108   :  { %p1894_p7 = pnand %p1893_p6, %p1887_p3 }
 0x10a   :  { %1897 = shalt.err (!%p1894_p7)
}
 0x10b   :  { %192 = dma.hbm_to_vmem [thread:$0]  %s2334_s14, 16, %s190_s21, [#allocation24]  }
 0x10c   :  { %s1981_s26 = smov [#allocation26]   ;;  %s1898_s30 = scalar_lea.hbm %s2335_s15, 2048 }
 0x10d   :  { %s198_s5 = sshll.u32 %s1981_s26, 4  ;;  %p1899_p8 = scmp.ne.s32.totalorder %s2335_s15, %s1898_s30  ;;  %s199_s5 = int_to_ptr.vmem [resolvable:$true] %s198_s5 }
 0x10e   :  { %p1902_p9 = scmp.lt.u32.totalorder %s1898_s30, %s2335_s15 }
 0x110   :  { %p1904_p10 = pnand %p1902_p9, %p1899_p8 }
 0x112   :  { %1907 = shalt.err (!%p1904_p10)
}
 0x113   :  { %s1908_s6 = scalar_lea.vmem %s199_s5, 2048  ;;  %p1913_p12 = scmp.lt.s32.totalorder %s199_s5, %s199_s5 }
 0x114   :  { %p1909_p11 = scmp.ne.s32.totalorder %s199_s5, %s1908_s6  ;;  %p1914_p13 = scmp.lt.s32.totalorder %s1908_s6, %s1908_s6 }
 0x116   :  { %p1915_p0 = por %p1914_p13, %p1913_p12 }
 0x118   :  { %p1916_p1 = pnand %p1915_p0, %p1909_p11 }
 0x11a   :  { %1919 = shalt.err (!%p1916_p1)
}
 0x11b   :  { %204 = dma.hbm_to_vmem [thread:$0]  %s2335_s15, 2048, %s199_s5, [#allocation27], %s1963_s0, %s1963_s0, %s1964_s17  }
 0x11c   :  { %1942 = dma.done.wait [#allocation3], 128  }
 0x11d   :  { %1943 = vsyncadd [#allocation3], 4294967168 }
 0x11e   :  { %1944 = dma.done.wait [#allocation6], 512  }
 0x11f   :  { %1945 = vsyncadd [#allocation6], 4294966784 }
 0x120   :  { %1946 = dma.done.wait [#allocation9], 80  }
 0x121   :  { %1947 = vsyncadd [#allocation9], 4294967216 }
 0x122   :  { %1948 = dma.done.wait [#allocation12], 32  }
 0x123   :  { %1949 = vsyncadd [#allocation12], 4294967264 }
 0x124   :  { %1950 = dma.done.wait [#allocation15], 1040  }
 0x125   :  { %1951 = vsyncadd [#allocation15], 4294966256 }
 0x126   :  { %1952 = dma.done.wait [#allocation18], 1040  }
 0x127   :  { %1953 = vsyncadd [#allocation18], 4294966256 }
 0x128   :  { %1954 = dma.done.wait [#allocation21], 32  }
 0x129   :  { %1955 = vsyncadd [#allocation21], 4294967264 }
 0x12a   :  { %1956 = dma.done.wait [#allocation24], 1040  }
 0x12b   :  { %1957 = vsyncadd [#allocation24], 4294966256 }
 0x12c   :  { %1958 = dma.done.wait [#allocation27], 2048  }
 0x12d   :  { %1959 = vsyncadd [#allocation27], 4294965248  ;;  %v1982_v0 = vmov 0.0   ;;  %vm1983_vm0 = vmmov 0   ;;  %v256_v1 = vld [vmem:[#allocation5] sm:$0xff]  ;;  %v257_v2 = vld [vmem:[#allocation5 + $0x8] sm:$0xff] }
 0x12e   :  { %1331 = vmatprep.subr.bf16.mxu1 %v1982_v0  ;;  %1333 = vmatprep.mubr.msk.bf16.mxu1 %vm1983_vm0, %v1982_v0  ;;  %v281_v3 = vpack.c.bf16 %v257_v2, %v256_v1  ;;  %v2287_v4 = vld [vmem:[#allocation2] sm:$0xff]   ;;  %v258_v5 = vld [vmem:[#allocation7] sm:$0xff]  ;;  %vm287_vm1 = vcmask 130048   ;;  %v260_v8 = vld [vmem:[#allocation8] sm:$0xf]  ;;  %vm389_vm2 = vcmask 1043456  }
 0x12f   :  { %v259_v6 = vld [vmem:[#allocation7 + $0x8] sm:$0xff]  ;;  %1480 = vmatprep.subr.msk.bf16.mxu0 %vm389_vm2, %v260_v8  ;;  %v391_v9 = vsel %vm389_vm2, %v260_v8, 0  ;;  %vm382_vm3 = vcmask 64512   ;;  %v1508_v24 = vld [vmem:[#allocation14] sm:$0xff]   ;;  %v1511_v27 = vld [vmem:[#allocation14 + $0x18] sm:$0xff]   ;;  %vm1188_vm4 = vcmask 7168  }
 0x130   :  { %1332 = vmatpush3.bf16.msra.mxu1 %v281_v3  ;;  %v332_v7 = vpack.c.bf16 %v259_v6, %v258_v5  ;;  %1344 = vmatpush3.bf16.msra.mxu0 %v391_v9  ;;  %v1509_v25 = vld [vmem:[#allocation14 + $0x8] sm:$0xff]   ;;  %v1510_v26 = vld [vmem:[#allocation14 + $0x10] sm:$0xff]   ;;  %v1512_v28 = vld [vmem:[#allocation14 + $0x20] sm:$0xff]   ;;  %s1985_s15 = smov [#allocation28]  }
 0x131   :  { %1337 = vmatprep.subr.bf16.mxu1 %v1982_v0  ;;  %1369 = vmatprep.subr.bf16.mxu0 %v1982_v0  ;;  %v1513_v29 = vld [vmem:[#allocation14 + $0x28] sm:$0xff]   ;;  %v1514_v30 = vld [vmem:[#allocation14 + $0x30] sm:$0xff]   ;;  %v1515_v31 = vld [vmem:[#allocation14 + $0x38] sm:$0xff]   ;;  %s1212_s0 = sshll.u32 %s1985_s15, 4  ;;  %s1213_s0 = int_to_ptr.vmem [resolvable:$true] %s1212_s0 }
 0x132   :  { %v1232_v33 = vld [vmem:[#allocation10] ss:$0 sm:$0xff]  ;;  %s1920_s10 = scalar_lea.vmem %s1213_s0, 16  ;;  %s1924_s13 = scalar_lea.vmem %s1213_s0, 32 }
 0x133   :  { %1334 = vmatmul.mubr.msk.bf16.vlgmr.msra.gmra.mrb[0].mxu1 %vm287_vm1, %v2287_v4  ;;  %p1921_p2 = scmp.ne.s32.totalorder %s1213_s0, %s1920_s10  ;;  %p1925_p3 = scmp.lt.s32.totalorder %s1213_s0, %s1213_s0 }
 0x134   :  { %1338 = vmatpush3.bf16.msra.mxu1 %v332_v7  ;;  %1339 = vmatprep.mubr.msk.bf16.mxu1 %vm1983_vm0, %v1982_v0  ;;  %p1926_p4 = scmp.lt.s32.totalorder %s1924_s13, %s1920_s10 }
 0x135   :  { %1349 = vmatprep.subr.bf16.mxu1 %v1508_v24 }
 0x136   :  { %p1927_p5 = por %p1926_p4, %p1925_p3 }
 0x138   :  { %p1928_p6 = pnand %p1927_p5, %p1921_p2 }
 0x13b   :  { %1340 = vmatmul.mubr.msk.bf16.vlgmr.msra.gmra.mrb[4].mxu1 %vm287_vm1, %v2287_v4 }
 0x13c   :  { %1350 = vmatpush3.bf16.msra.mxu1 %v1508_v24 }
 0x13d   :  { %1351 = vmatprep.subr.bf16.mxu1 %v1509_v25 }
 0x140   :  { %1352 = vmatpush3.bf16.msra.mxu1 %v1509_v25 }
 0x141   :  { %1353 = vmatprep.subr.bf16.mxu1 %v1510_v26 }
 0x144   :  { %1354 = vmatpush3.bf16.msra.mxu1 %v1510_v26  ;;  %v1236_v26 = vld [vmem:[#allocation13] ss:$0 sm:$0xff] }
 0x145   :  { %1355 = vmatprep.subr.bf16.mxu1 %v1511_v27 }
 0x148   :  { %1356 = vmatpush3.bf16.msra.mxu1 %v1511_v27 }
 0x149   :  { %1357 = vmatprep.subr.bf16.mxu1 %v1512_v28 }
 0x14c   :  { %1358 = vmatpush3.bf16.msra.mxu1 %v1512_v28 }
 0x14d   :  { %1359 = vmatprep.subr.bf16.mxu1 %v1513_v29 }
 0x150   :  { %1360 = vmatpush3.bf16.msra.mxu1 %v1513_v29 }
 0x151   :  { %1361 = vmatprep.subr.bf16.mxu1 %v1514_v30 }
 0x154   :  { %1362 = vmatpush3.bf16.msra.mxu1 %v1514_v30 }
 0x155   :  { %1363 = vmatprep.subr.bf16.mxu1 %v1515_v31 }
 0x158   :  { %1364 = vmatpush3.bf16.msra.mxu1 %v1515_v31 }
 0x206   :  { %v325_v10 = vpop.f32.mrb[0].mxu1 }
 0x207   :  { %v1335_v11 = vpop.f32.mrb[1].mxu1  ;;  %v326_v13 = vadd.f32 %v325_v10, %v256_v1 }
 0x208   :  { %v328_v12 = vpop.f32.mrb[2].mxu1 }
 0x209   :  { %v329_v14 = vadd.f32 %v328_v12, %v257_v2  ;;  %v1336_v15 = vpop.f32.mrb[3].mxu1 }
 0x20b   :  { %v374_v16 = vpack.c.bf16 %v329_v14, %v326_v13 }
 0x20d   :  { %1345 = vmatprep.mubr.msk.bf16.mxu0 %vm382_vm3, %v374_v16 }
 0x20e   :  { %v367_v17 = vpop.f32.mrb[4].mxu1 }
 0x20f   :  { %v1341_v18 = vpop.f32.mrb[5].mxu1  ;;  %v368_v20 = vadd.f32 %v367_v17, %v258_v5 }
 0x210   :  { %v370_v19 = vpop.f32.mrb[6].mxu1 }
 0x211   :  { %v371_v21 = vadd.f32 %v370_v19, %v259_v6  ;;  %v1342_v22 = vpop.f32.mrb[7].mxu1 }
 0x212   :  { %v1235_v22 = vld [vmem:[#allocation11] ss:$0 sm:$0xff] }
 0x213   :  { %v375_v23 = vpack.c.bf16 %v371_v21, %v368_v20 }
 0x215   :  { %1346 = vmatmul.mubr.msk.bf16.vlgmr.msra.gmra.mrb[0].mxu0 %vm382_vm3, %v375_v23 }
 0x216   :  { %1371 = vmatprep.mubr.msk.bf16.mxu0 %vm1983_vm0, %v1982_v0 }
 0x2e8   :  { %v1347_v32 = vpop.f32.mrb[0].mxu0 }
 0x2e9   :  { %v427_v34 = vpop.f32.mrb[1].mxu0  ;;  %v436_v36 = vadd.f32 %v1347_v32, %v1232_v33 }
 0x2ea   :  { %v1348_v35 = vpop.f32.mrb[2].mxu0  ;;  %v428_v39 = vadd.f32 %v1232_v33, %v427_v34 }
 0x2eb   :  { %v439_v37 = vadd.f32 %v1348_v35, %v1232_v33  ;;  %v430_v38 = vpop.f32.mrb[3].mxu0 }
 0x2ec   :  { %v431_v40 = vadd.f32 %v1232_v33, %v430_v38 }
 0x2ed   :  { %v485_v41 = vadd.f32 %v439_v37, %v436_v36 }
 0x2ee   :  { %v442_v42 = vadd.f32 %v431_v40, %v428_v39 }
 0x2ef   :  { %v486_v43 = vrot.slane %v485_v41, 4 }
 0x2f0   :  { %v443_v44 = vrot.slane %v442_v42, 4 }
 0x2f1   :  { %v487_v45 = vadd.f32 %v486_v43, %v485_v41  ;;  %v1237_v43 = vld [vmem:[#allocation16] ss:$0 sm:$0xff] }
 0x2f2   :  { %v444_v46 = vadd.f32 %v443_v44, %v442_v42 }
 0x2f3   :  { %v488_v47 = vrot.slane %v487_v45, 2 }
 0x2f4   :  { %v445_v48 = vrot.slane %v444_v46, 2 }
 0x2f5   :  { %v489_v49 = vadd.f32 %v488_v47, %v487_v45 }
 0x2f6   :  { %v446_v50 = vadd.f32 %v445_v48, %v444_v46 }
 0x2f7   :  { %v490_v51 = vrot.slane %v489_v49, 1 }
 0x2f8   :  { %v447_v52 = vrot.slane %v446_v50, 1 }
 0x2f9   :  { %v491_v53 = vadd.f32 %v490_v51, %v489_v49 }
 0x2fa   :  { %v448_v54 = vadd.f32 %v447_v52, %v446_v50 }
 0x2fb   :  { %v492_v55 = vmul.f32 0.0625, %v491_v53 }
 0x2fc   :  { %v450_v56 = vmul.f32 0.0625, %v448_v54 }
 0x2fd   :  { %v493_v57 = vsub.f32 %v436_v36, %v492_v55  ;;  %v494_v58 = vsub.f32 %v439_v37, %v492_v55 }
 0x2fe   :  { %v451_v59 = vsub.f32 %v428_v39, %v450_v56  ;;  %v452_v60 = vsub.f32 %v431_v40, %v450_v56 }
 0x2ff   :  { %v495_v61 = vmul.f32 %v493_v57, %v493_v57  ;;  %v496_v62 = vmul.f32 %v494_v58, %v494_v58 }
 0x300   :  { %v453_v63 = vmul.f32 %v451_v59, %v451_v59  ;;  %v454_v1 = vmul.f32 %v452_v60, %v452_v60 }
 0x301   :  { %v497_v2 = vadd.f32 %v496_v62, %v495_v61  ;;  %v1519_v61 = vld [vmem:[#allocation17 + $0x18] sm:$0xff]   ;;  %v1520_v62 = vld [vmem:[#allocation17 + $0x20] sm:$0xff]  }
 0x302   :  { %v455_v3 = vadd.f32 %v454_v1, %v453_v63  ;;  %v1521_v63 = vld [vmem:[#allocation17 + $0x28] sm:$0xff]   ;;  %v1522_v1 = vld [vmem:[#allocation17 + $0x30] sm:$0xff]  }
 0x303   :  { %v498_v5 = vrot.slane %v497_v2, 4 }
 0x304   :  { %v456_v6 = vrot.slane %v455_v3, 4 }
 0x305   :  { %v499_v7 = vadd.f32 %v498_v5, %v497_v2  ;;  %v1523_v2 = vld [vmem:[#allocation17 + $0x38] sm:$0xff]  }
 0x306   :  { %v457_v8 = vadd.f32 %v456_v6, %v455_v3 }
 0x307   :  { %v500_v9 = vrot.slane %v499_v7, 2 }
 0x308   :  { %v458_v10 = vrot.slane %v457_v8, 2 }
 0x309   :  { %v501_v11 = vadd.f32 %v500_v9, %v499_v7 }
 0x30a   :  { %v459_v12 = vadd.f32 %v458_v10, %v457_v8 }
 0x30b   :  { %v502_v13 = vrot.slane %v501_v11, 1 }
 0x30c   :  { %v460_v14 = vrot.slane %v459_v12, 1 }
 0x30d   :  { %v503_v15 = vadd.f32 %v502_v13, %v501_v11 }
 0x30e   :  { %v461_v16 = vadd.f32 %v460_v14, %v459_v12 }
 0x30f   :  { %v504_v17 = vmul.f32 0.0625, %v503_v15 }
 0x310   :  { %v462_v18 = vmul.f32 0.0625, %v461_v16 }
 0x311   :  { %v505_v19 = vadd.f32 1e-05, %v504_v17  ;;  %v1524_v17 = vld [vmem:[#allocation23] sm:$0xff]  }
 0x312   :  { %v463_v20 = vadd.f32 1e-05, %v462_v18  ;;  %1401 = vmatprep.subr.bf16.mxu1 %v1524_v17  ;;  %v1525_v18 = vld [vmem:[#allocation23 + $0x8] sm:$0xff]  }
 0x313   :  { %1532 = vrsqrt.f32 %v505_v19  ;;  %v1526_v19 = vld [vmem:[#allocation23 + $0x10] sm:$0xff]  }
 0x314   :  { %1534 = vrsqrt.f32 %v463_v20  ;;  %v1527_v20 = vld [vmem:[#allocation23 + $0x18] sm:$0xff]  }
 0x31d   :  { %v1533_v21 = vpop.eup %1532 }
 0x31e   :  { %v1535_v23 = vpop.eup %1534  ;;  %v507_v24 = vmul.f32 %v1533_v21, %v493_v57  ;;  %v508_v25 = vmul.f32 %v1533_v21, %v494_v58  ;;  %v1516_v57 = vld [vmem:[#allocation17] sm:$0xff]  }
 0x31f   :  { %v465_v27 = vmul.f32 %v1535_v23, %v451_v59  ;;  %v466_v28 = vmul.f32 %v1535_v23, %v452_v60  ;;  %v1517_v59 = vld [vmem:[#allocation17 + $0x8] sm:$0xff]   ;;  %v1518_v60 = vld [vmem:[#allocation17 + $0x10] sm:$0xff]  }
 0x320   :  { %v509_v29 = vmul.f32 %v1235_v22, %v507_v24  ;;  %v510_v30 = vmul.f32 %v1235_v22, %v508_v25  ;;  %v1528_v21 = vld [vmem:[#allocation23 + $0x20] sm:$0xff]   ;;  %v1530_v23 = vld [vmem:[#allocation23 + $0x30] sm:$0xff]   ;;  %v1248_v25 = vld [vmem:[#allocation19] ss:$0 sm:$0xff] }
 0x321   :  { %v474_v31 = vmul.f32 %v1235_v22, %v466_v28  ;;  %v473_v32 = vmul.f32 %v1235_v22, %v465_v27  ;;  %v1529_v22 = vld [vmem:[#allocation23 + $0x28] sm:$0xff]  }
 0x322   :  { %v512_v33 = vadd.f32 %v1236_v26, %v510_v30  ;;  %v511_v34 = vadd.f32 %v1236_v26, %v509_v29 }
 0x323   :  { %v481_v35 = vadd.f32 %v1236_v26, %v473_v32  ;;  %v482_v36 = vadd.f32 %v1236_v26, %v474_v31 }
 0x324   :  { %v514_v37 = vmax.f32 %v512_v33, 0.0  ;;  %v513_v38 = vmax.f32 %v511_v34, 0.0 }
 0x325   :  { %v483_v39 = vmax.f32 %v481_v35, 0.0  ;;  %v484_v40 = vmax.f32 %v482_v36, 0.0 }
 0x326   :  { %v516_v41 = vpack.c.bf16 %v514_v37, %v513_v38 }
 0x327   :  { %v515_v42 = vpack.c.bf16 %v484_v40, %v483_v39 }
 0x329   :  { %1365 = vmatprep.mubr.bf16.mxu1 %v515_v42 }
 0x32a   :  { %1366 = vmatmul.mubr.bf16.vlgmr.msra.gmra.mrb[8].mxu1 %v516_v41 }
 0x32b   :  { %1402 = vmatpush3.bf16.msra.mxu1 %v1524_v17  ;;  %v1258_v17 = vld [vmem:[#allocation22] ss:$0 sm:$0xff] }
 0x32c   :  { %1403 = vmatprep.subr.bf16.mxu1 %v1525_v18 }
 0x32f   :  { %1404 = vmatpush3.bf16.msra.mxu1 %v1525_v18 }
 0x330   :  { %1405 = vmatprep.subr.bf16.mxu1 %v1526_v19 }
 0x333   :  { %1406 = vmatpush3.bf16.msra.mxu1 %v1526_v19 }
 0x334   :  { %1407 = vmatprep.subr.bf16.mxu1 %v1527_v20 }
 0x337   :  { %1408 = vmatpush3.bf16.msra.mxu1 %v1527_v20 }
 0x338   :  { %1409 = vmatprep.subr.bf16.mxu1 %v1528_v21 }
 0x33b   :  { %1410 = vmatpush3.bf16.msra.mxu1 %v1528_v21 }
 0x33c   :  { %1411 = vmatprep.subr.bf16.mxu1 %v1529_v22 }
 0x33f   :  { %1412 = vmatpush3.bf16.msra.mxu1 %v1529_v22 }
 0x340   :  { %1413 = vmatprep.subr.bf16.mxu1 %v1530_v23 }
 0x343   :  { %1414 = vmatpush3.bf16.msra.mxu1 %v1530_v23 }
 0x3fd   :  { %v1367_v44 = vpop.f32.mrb[8].mxu1 }
 0x3fe   :  { %v605_v45 = vpop.f32.mrb[9].mxu1  ;;  %v614_v51 = vadd.f32 %v1367_v44, %v1237_v43 }
 0x3ff   :  { %v606_v46 = vadd.f32 %v1237_v43, %v605_v45  ;;  %v1368_v47 = vpop.f32.mrb[10].mxu1 }
 0x400   :  { %v608_v48 = vpop.f32.mrb[11].mxu1  ;;  %v617_v49 = vadd.f32 %v1368_v47, %v1237_v43  ;;  %v622_v56 = vmax.f32 %v614_v51, 0.0 }
 0x401   :  { %v609_v50 = vadd.f32 %v1237_v43, %v608_v48  ;;  %v620_v52 = vmax.f32 %v606_v46, 0.0 }
 0x402   :  { %v623_v54 = vmax.f32 %v617_v49, 0.0 }
 0x403   :  { %v621_v53 = vmax.f32 %v609_v50, 0.0 }
 0x404   :  { %v702_v58 = vpack.c.bf16 %v623_v54, %v622_v56 }
 0x405   :  { %v660_v55 = vpack.c.bf16 %v621_v53, %v620_v52 }
 0x407   :  { %1370 = vmatpush3.bf16.msra.mxu0 %v660_v55 }
 0x408   :  { %1375 = vmatprep.subr.bf16.mxu0 %v1982_v0 }
 0x40a   :  { %1372 = vmatmul.mubr.msk.bf16.vlgmr.msra.gmra.mrb[4].mxu0 %vm287_vm1, %v2287_v4 }
 0x40b   :  { %1376 = vmatpush3.bf16.msra.mxu0 %v702_v58  ;;  %1377 = vmatprep.mubr.msk.bf16.mxu0 %vm1983_vm0, %v1982_v0 }
 0x40c   :  { %1381 = vmatprep.subr.bf16.mxu0 %v1516_v57 }
 0x412   :  { %1378 = vmatmul.mubr.msk.bf16.vlgmr.msra.gmra.mrb[8].mxu0 %vm287_vm1, %v2287_v4 }
 0x413   :  { %1382 = vmatpush3.bf16.msra.mxu0 %v1516_v57 }
 0x414   :  { %1383 = vmatprep.subr.bf16.mxu0 %v1517_v59 }
 0x417   :  { %1384 = vmatpush3.bf16.msra.mxu0 %v1517_v59 }
 0x418   :  { %1385 = vmatprep.subr.bf16.mxu0 %v1518_v60 }
 0x41b   :  { %1386 = vmatpush3.bf16.msra.mxu0 %v1518_v60 }
 0x41c   :  { %1387 = vmatprep.subr.bf16.mxu0 %v1519_v61 }
 0x41f   :  { %1388 = vmatpush3.bf16.msra.mxu0 %v1519_v61 }
 0x420   :  { %1389 = vmatprep.subr.bf16.mxu0 %v1520_v62 }
 0x423   :  { %1390 = vmatpush3.bf16.msra.mxu0 %v1520_v62 }
 0x424   :  { %1391 = vmatprep.subr.bf16.mxu0 %v1521_v63 }
 0x427   :  { %1392 = vmatpush3.bf16.msra.mxu0 %v1521_v63 }
 0x428   :  { %1393 = vmatprep.subr.bf16.mxu0 %v1522_v1 }
 0x42b   :  { %1394 = vmatpush3.bf16.msra.mxu0 %v1522_v1 }
 0x42c   :  { %1395 = vmatprep.subr.bf16.mxu0 %v1523_v2 }
 0x42f   :  { %1396 = vmatpush3.bf16.msra.mxu0 %v1523_v2 }
 0x4dd   :  { %v695_v4 = vpop.f32.mrb[4].mxu0 }
 0x4de   :  { %v1373_v3 = vpop.f32.mrb[5].mxu0  ;;  %v696_v6 = vadd.f32 %v695_v4, %v620_v52 }
 0x4df   :  { %v698_v5 = vpop.f32.mrb[6].mxu0 }
 0x4e0   :  { %v699_v7 = vadd.f32 %v698_v5, %v621_v53  ;;  %v1374_v8 = vpop.f32.mrb[7].mxu0 }
 0x4e2   :  { %v744_v9 = vpack.c.bf16 %v699_v7, %v696_v6 }
 0x4e4   :  { %1397 = vmatprep.mubr.bf16.mxu0 %v744_v9 }
 0x4e5   :  { %v737_v10 = vpop.f32.mrb[8].mxu0 }
 0x4e6   :  { %v1379_v11 = vpop.f32.mrb[9].mxu0  ;;  %v738_v13 = vadd.f32 %v737_v10, %v622_v56 }
 0x4e7   :  { %v740_v12 = vpop.f32.mrb[10].mxu0 }
 0x4e8   :  { %v741_v14 = vadd.f32 %v740_v12, %v623_v54  ;;  %v1380_v15 = vpop.f32.mrb[11].mxu0 }
 0x4ea   :  { %v745_v16 = vpack.c.bf16 %v741_v14, %v738_v13  ;;  %v1257_v13 = vld [vmem:[#allocation20] ss:$0 sm:$0xff] }
 0x4ec   :  { %1398 = vmatmul.mubr.bf16.vlgmr.msra.gmra.mrb[12].mxu0 %v745_v16 }
 0x4ed   :  { %1453 = vmatprep.mubr.msk.f32.mxu0 %vm1983_vm0, %v1982_v0  ;;  %v1531_v0 = vld [vmem:[#allocation23 + $0x38] sm:$0xff]  }
 0x4ee   :  { %1415 = vmatprep.subr.bf16.mxu1 %v1531_v0 }
 0x4ef   :  { %1416 = vmatpush3.bf16.msra.mxu1 %v1531_v0 }
 0x5bf   :  { %v1399_v24 = vpop.f32.mrb[12].mxu0 }
 0x5c0   :  { %v834_v26 = vpop.f32.mrb[13].mxu0  ;;  %v843_v28 = vadd.f32 %v1399_v24, %v1248_v25 }
 0x5c1   :  { %v1400_v27 = vpop.f32.mrb[14].mxu0  ;;  %v835_v31 = vadd.f32 %v1248_v25, %v834_v26 }
 0x5c2   :  { %v846_v29 = vadd.f32 %v1400_v27, %v1248_v25  ;;  %v837_v30 = vpop.f32.mrb[15].mxu0 }
 0x5c3   :  { %v838_v32 = vadd.f32 %v1248_v25, %v837_v30 }
 0x5c4   :  { %v891_v33 = vadd.f32 %v846_v29, %v843_v28 }
 0x5c5   :  { %v849_v34 = vadd.f32 %v838_v32, %v835_v31 }
 0x5c6   :  { %v892_v35 = vrot.slane %v891_v33, 4 }
 0x5c7   :  { %v850_v36 = vrot.slane %v849_v34, 4 }
 0x5c8   :  { %v893_v37 = vadd.f32 %v892_v35, %v891_v33  ;;  %v1044_v33 = vld [vmem:[#allocation26] sm:$0xff] }
 0x5c9   :  { %v851_v38 = vadd.f32 %v850_v36, %v849_v34  ;;  %v1045_v34 = vld [vmem:[#allocation26 + $0x8] sm:$0xff]  ;;  %v1984_v36 = vmov 0.0|0.0  }
 0x5ca   :  { %v894_v39 = vrot.slane %v893_v37, 2  ;;  %v1457_v35 = vpack.c.bf16 %v1045_v34, %v1044_v33  ;;  %1456 = vmatprep.subr.bf16.mxu0 %v1984_v36 }
 0x5cb   :  { %v852_v40 = vrot.slane %v851_v38, 2 }
 0x5cc   :  { %v895_v41 = vadd.f32 %v894_v39, %v893_v37  ;;  %1458 = vmatpush3.bf16.msra.mxu0 %v1457_v35  ;;  %v1046_v37 = vld [vmem:[#allocation26 + $0x10] sm:$0xff] }
 0x5cd   :  { %v853_v42 = vadd.f32 %v852_v40, %v851_v38  ;;  %1459 = vmatprep.subr.bf16.mxu0 %v1984_v36  ;;  %v1047_v38 = vld [vmem:[#allocation26 + $0x18] sm:$0xff]  ;;  %v1048_v40 = vld [vmem:[#allocation26 + $0x20] sm:$0xff] }
 0x5ce   :  { %v896_v43 = vrot.slane %v895_v41, 1  ;;  %v1460_v39 = vpack.c.bf16 %v1047_v38, %v1046_v37 }
 0x5cf   :  { %v854_v44 = vrot.slane %v853_v42, 1 }
 0x5d0   :  { %v897_v45 = vadd.f32 %v896_v43, %v895_v41  ;;  %1461 = vmatpush3.bf16.msra.mxu0 %v1460_v39  ;;  %v1049_v41 = vld [vmem:[#allocation26 + $0x28] sm:$0xff]  ;;  %v1050_v43 = vld [vmem:[#allocation26 + $0x30] sm:$0xff] }
 0x5d1   :  { %v855_v46 = vadd.f32 %v854_v44, %v853_v42  ;;  %1462 = vmatprep.subr.bf16.mxu0 %v1984_v36  ;;  %v1463_v42 = vpack.c.bf16 %v1049_v41, %v1048_v40  ;;  %v1051_v44 = vld [vmem:[#allocation26 + $0x38] sm:$0xff] }
 0x5d2   :  { %v898_v47 = vmul.f32 0.0625, %v897_v45  ;;  %v1466_v45 = vpack.c.bf16 %v1051_v44, %v1050_v43 }
 0x5d3   :  { %v856_v48 = vmul.f32 0.0625, %v855_v46  ;;  %v1052_v46 = vld [vmem:[#allocation26 + $0x40] sm:$0xff] }
 0x5d4   :  { %v899_v49 = vsub.f32 %v843_v28, %v898_v47  ;;  %v900_v50 = vsub.f32 %v846_v29, %v898_v47  ;;  %1464 = vmatpush3.bf16.msra.mxu0 %v1463_v42  ;;  %v1053_v47 = vld [vmem:[#allocation26 + $0x48] sm:$0xff] }
 0x5d5   :  { %v857_v51 = vsub.f32 %v835_v31, %v856_v48  ;;  %v858_v52 = vsub.f32 %v838_v32, %v856_v48  ;;  %1465 = vmatprep.subr.bf16.mxu0 %v1984_v36  ;;  %v1469_v48 = vpack.c.bf16 %v1053_v47, %v1052_v46 }
 0x5d6   :  { %v901_v53 = vmul.f32 %v899_v49, %v899_v49  ;;  %v902_v54 = vmul.f32 %v900_v50, %v900_v50 }
 0x5d7   :  { %v859_v55 = vmul.f32 %v857_v51, %v857_v51  ;;  %v860_v56 = vmul.f32 %v858_v52, %v858_v52 }
 0x5d8   :  { %v903_v57 = vadd.f32 %v902_v54, %v901_v53  ;;  %1467 = vmatpush3.bf16.msra.mxu0 %v1466_v45  ;;  %v1057_v53 = vld [vmem:[#allocation26 + $0x68] sm:$0xff] }
 0x5d9   :  { %v861_v58 = vadd.f32 %v860_v56, %v859_v55  ;;  %1468 = vmatprep.subr.bf16.mxu0 %v1984_v36  ;;  %v1058_v55 = vld [vmem:[#allocation26 + $0x70] sm:$0xff]  ;;  %v1059_v56 = vld [vmem:[#allocation26 + $0x78] sm:$0xff] }
 0x5da   :  { %v904_v59 = vrot.slane %v903_v57, 4 }
 0x5db   :  { %v862_v60 = vrot.slane %v861_v58, 4 }
 0x5dc   :  { %v905_v61 = vadd.f32 %v904_v59, %v903_v57  ;;  %1470 = vmatpush3.bf16.msra.mxu0 %v1469_v48  ;;  %v1478_v57 = vpack.c.bf16 %v1059_v56, %v1058_v55 }
 0x5dd   :  { %v863_v62 = vadd.f32 %v862_v60, %v861_v58  ;;  %1471 = vmatprep.subr.bf16.mxu0 %v1984_v36  ;;  %v1259_v58 = vld [vmem:[#allocation25] ss:$0 sm:$0xff] }
 0x5de   :  { %v906_v63 = vrot.slane %v905_v61, 2 }
 0x5df   :  { %v864_v1 = vrot.slane %v863_v62, 2 }
 0x5e0   :  { %v907_v2 = vadd.f32 %v906_v63, %v905_v61 }
 0x5e1   :  { %v865_v4 = vadd.f32 %v864_v1, %v863_v62 }
 0x5e2   :  { %v908_v3 = vrot.slane %v907_v2, 1 }
 0x5e3   :  { %v866_v5 = vrot.slane %v865_v4, 1 }
 0x5e4   :  { %v909_v6 = vadd.f32 %v908_v3, %v907_v2 }
 0x5e5   :  { %v867_v7 = vadd.f32 %v866_v5, %v865_v4 }
 0x5e6   :  { %v910_v8 = vmul.f32 0.0625, %v909_v6 }
 0x5e7   :  { %v868_v9 = vmul.f32 0.0625, %v867_v7 }
 0x5e8   :  { %v911_v10 = vadd.f32 1e-05, %v910_v8 }
 0x5e9   :  { %v869_v11 = vadd.f32 1e-05, %v868_v9 }
 0x5ea   :  { %1536 = vrsqrt.f32 %v911_v10 }
 0x5eb   :  { %1538 = vrsqrt.f32 %v869_v11 }
 0x5f4   :  { %v1537_v12 = vpop.eup %1536 }
 0x5f5   :  { %v1539_v14 = vpop.eup %1538  ;;  %v913_v15 = vmul.f32 %v1537_v12, %v899_v49  ;;  %v914_v16 = vmul.f32 %v1537_v12, %v900_v50  ;;  %v1054_v49 = vld [vmem:[#allocation26 + $0x50] sm:$0xff]  ;;  %v1055_v50 = vld [vmem:[#allocation26 + $0x58] sm:$0xff] }
 0x5f6   :  { %v871_v18 = vmul.f32 %v1539_v14, %v857_v51  ;;  %v872_v19 = vmul.f32 %v1539_v14, %v858_v52  ;;  %v1472_v51 = vpack.c.bf16 %v1055_v50, %v1054_v49  ;;  %v1056_v52 = vld [vmem:[#allocation26 + $0x60] sm:$0xff] }
 0x5f7   :  { %v915_v20 = vmul.f32 %v1257_v13, %v913_v15  ;;  %v916_v21 = vmul.f32 %v1257_v13, %v914_v16  ;;  %v1475_v54 = vpack.c.bf16 %v1057_v53, %v1056_v52 }
 0x5f8   :  { %v880_v22 = vmul.f32 %v1257_v13, %v872_v19  ;;  %v879_v23 = vmul.f32 %v1257_v13, %v871_v18  ;;  %1473 = vmatpush3.bf16.msra.mxu0 %v1472_v51  ;;  %v1130_v18 = vlaneseq }
 0x5f9   :  { %v918_v0 = vadd.f32 %v1258_v17, %v916_v21  ;;  %v917_v24 = vadd.f32 %v1258_v17, %v915_v20  ;;  %1474 = vmatprep.subr.bf16.mxu0 %v1984_v36 }
 0x5fa   :  { %v887_v25 = vadd.f32 %v1258_v17, %v879_v23  ;;  %v888_v26 = vadd.f32 %v1258_v17, %v880_v22  ;;  %v1131_v19 = vshrl.u32 %v1130_v18, 7 }
 0x5fb   :  { %v920_v27 = vmax.f32 %v918_v0, 0.0  ;;  %v919_v28 = vmax.f32 %v917_v24, 0.0 }
 0x5fc   :  { %v889_v29 = vmax.f32 %v887_v25, 0.0  ;;  %v890_v30 = vmax.f32 %v888_v26, 0.0  ;;  %1476 = vmatpush3.bf16.msra.mxu0 %v1475_v54  ;;  %v1132_v20 = vsub.s32 0, %v1131_v19 }
 0x5fd   :  { %v922_v31 = vpack.c.bf16 %v920_v27, %v919_v28  ;;  %1477 = vmatprep.subr.bf16.mxu0 %v1984_v36 }
 0x5fe   :  { %v921_v32 = vpack.c.bf16 %v890_v30, %v889_v29 }
 0x600   :  { %1417 = vmatprep.mubr.bf16.mxu1 %v921_v32  ;;  %1479 = vmatpush3.bf16.msra.mxu0 %v1478_v57 }
 0x601   :  { %1418 = vmatmul.mubr.bf16.vlgmr.msra.gmra.mrb[12].mxu1 %v922_v31 }
 0x6d4   :  { %v1419_v59 = vpop.f32.mrb[12].mxu1 }
 0x6d5   :  { %v1020_v60 = vadd.f32 %v1419_v59, %v1259_v58  ;;  %v1011_v61 = vpop.f32.mrb[13].mxu1 }
 0x6d6   :  { %v1012_v62 = vadd.f32 %v1259_v58, %v1011_v61  ;;  %v1420_v63 = vpop.f32.mrb[14].mxu1 }
 0x6d7   :  { %v1023_v1 = vadd.f32 %v1420_v63, %v1259_v58  ;;  %v1014_v2 = vpop.f32.mrb[15].mxu1  ;;  %v1028_v22 = vmax.f32 %v1020_v60, 0.0 }
 0x6d8   :  { %v1015_v4 = vadd.f32 %v1259_v58, %v1014_v2  ;;  %v1026_v3 = vmax.f32 %v1012_v62, 0.0 }
 0x6d9   :  { %v1029_v23 = vmax.f32 %v1023_v1, 0.0 }
 0x6da   :  { %v1027_v5 = vmax.f32 %v1015_v4, 0.0 }
 0x6dc   :  { %v1030_v6 = vadd.f32 %v1027_v5, %v1026_v3 }
 0x6de   :  { %v1031_v7 = vrot.slane %v1030_v6, 4 }
 0x6e0   :  { %v1032_v8 = vadd.f32 %v1031_v7, %v1030_v6 }
 0x6e2   :  { %v1033_v9 = vrot.slane %v1032_v8, 2 }
 0x6e4   :  { %v1034_v10 = vadd.f32 %v1033_v9, %v1032_v8 }
 0x6e6   :  { %v1035_v11 = vrot.slane %v1034_v10, 1 }
 0x6e8   :  { %v1036_v12 = vadd.f32 %v1035_v11, %v1034_v10 }
 0x6ea   :  { %v1268_v13 = vmul.f32 -0.0625, %v1036_v12 }
 0x6ec   :  { %v1039_v14 = vmul.f32 1.442695, %v1268_v13 }
 0x6ee   :  { %1540 = vpow2.f32 %v1039_v14 }
 0x6f8   :  { %v1541_v15 = vpop.eup %1540 }
 0x6f9   :  { %v1041_v16 = vadd.f32 1.0, %v1541_v15 }
 0x6fb   :  { %1542 = vrcp.f32 %v1041_v16 }
 0x705   :  { %v1543_v17 = vpop.eup %1542 }
 0x706   :  { %1454 = vmatmul.mubr.f32.vlgmr.msra.gmra.mrb[16].mxu0 %v1543_v17 }
 0x7d9   :  { %v1126_v21 = vpop.f32.mrb[16].mxu0 }
 0x7da   :  { %v1133_v0 = vrot.slane %v1126_v21, %v1132_v20  ;;  %v1455_v24 = vpop.f32.mrb[17].mxu0 }
 0x7dc   :  { %v1152_v25 = vmul.f32 %v1133_v0, %v1028_v22  ;;  %v1134_v26 = vmul.f32 %v1133_v0, %v1026_v3  ;;  %v1153_v27 = vmul.f32 %v1133_v0, %v1029_v23  ;;  %v1135_v28 = vmul.f32 %v1133_v0, %v1027_v5 }
 0x7de   :  { %1154 = vadd.xlane.f32.xlu1 %v1152_v25  ;;  %1136 = vadd.xlane.f32.xlu0 %v1134_v26 }
 0x7e2   :  { %1156 = vadd.xlane.f32.xlu1 %v1153_v27  ;;  %1138 = vadd.xlane.f32.xlu0 %v1135_v28 }
 0x86b   :  { %v1155_v29 = vpop.xlane.xlu1 %1154  ;;  %v1137_v30 = vpop.xlane.xlu0 %1136 }
 0x86c   :  { %v1271_v31 = vmul.f32 -1.442695, %v1155_v29  ;;  %v1269_v32 = vmul.f32 -1.442695, %v1137_v30 }
 0x86e   :  { %1544 = vpow2.f32 %v1271_v31 }
 0x86f   :  { %1546 = vpow2.f32 %v1269_v32  ;;  %v1157_v33 = vpop.xlane.xlu1 %1156  ;;  %v1139_v34 = vpop.xlane.xlu0 %1138 }
 0x870   :  { %v1272_v35 = vmul.f32 -1.442695, %v1157_v33  ;;  %v1270_v36 = vmul.f32 -1.442695, %v1139_v34 }
 0x872   :  { %1548 = vpow2.f32 %v1272_v35 }
 0x873   :  { %1550 = vpow2.f32 %v1270_v36 }
 0x878   :  { %v1545_v37 = vpop.eup %1544 }
 0x879   :  { %v1547_v38 = vpop.eup %1546  ;;  %v1164_v39 = vadd.f32 1.0, %v1545_v37 }
 0x87a   :  { %v1146_v40 = vadd.f32 1.0, %v1547_v38 }
 0x87b   :  { %1552 = vrcp.f32 %v1164_v39 }
 0x87c   :  { %v1549_v41 = vpop.eup %1548  ;;  %1554 = vrcp.f32 %v1146_v40 }
 0x87d   :  { %v1551_v42 = vpop.eup %1550  ;;  %v1165_v43 = vadd.f32 1.0, %v1549_v41 }
 0x87e   :  { %v1147_v44 = vadd.f32 1.0, %v1551_v42 }
 0x87f   :  { %1556 = vrcp.f32 %v1165_v43 }
 0x880   :  { %1558 = vrcp.f32 %v1147_v44 }
 0x885   :  { %v1553_v45 = vpop.eup %1552 }
 0x886   :  { %v1555_v46 = vpop.eup %1554  ;;  %v1178_v47 = vsub.f32 1.0, %v1553_v45 }
 0x887   :  { %1560 = vlog2.f32 %v1555_v46 }
 0x888   :  { %1562 = vlog2.f32 %v1178_v47 }
 0x889   :  { %v1557_v48 = vpop.eup %1556 }
 0x88a   :  { %v1559_v49 = vpop.eup %1558  ;;  %v1179_v50 = vsub.f32 1.0, %v1557_v48 }
 0x88b   :  { %1564 = vlog2.f32 %v1559_v49 }
 0x88c   :  { %1566 = vlog2.f32 %v1179_v50 }
 0x891   :  { %v1561_v51 = vpop.eup %1560 }
 0x892   :  { %v1563_v52 = vpop.eup %1562  ;;  %v1171_v53 = vmul.f32 0.6931472, %v1561_v51 }
 0x893   :  { %v1181_v54 = vmul.f32 0.6931472, %v1563_v52 }
 0x894   :  { %v1174_v55 = vmax.f32 %v1171_v53, -100.0 }
 0x895   :  { %v1565_v56 = vpop.eup %1564  ;;  %v1184_v60 = vmax.f32 %v1181_v54, -100.0 }
 0x896   :  { %v1567_v57 = vpop.eup %1566  ;;  %v1173_v58 = vmul.f32 0.6931472, %v1565_v56  ;;  %v1176_v59 = vsub.f32 0.0, %v1174_v55 }
 0x897   :  { %v1183_v61 = vmul.f32 0.6931472, %v1567_v57 }
 0x898   :  { %v1175_v62 = vmax.f32 %v1173_v58, -100.0  ;;  %v1186_v2 = vsub.f32 %v1176_v59, %v1184_v60 }
 0x899   :  { %v1185_v63 = vmax.f32 %v1183_v61, -100.0 }
 0x89a   :  { %v1177_v1 = vsub.f32 0.0, %v1175_v62  ;;  %v1189_v3 = vsel %vm1188_vm4, %v1186_v2, 0.0 }
 0x89c   :  { %v1187_v4 = vsub.f32 %v1177_v1, %v1185_v63 }
 0x89e   :  { %v1190_v5 = vsel %vm1188_vm4, %v1187_v4, 0.0 }
 0x89f   :  { %v1191_v6 = vadd.f32 %v1190_v5, %v1189_v3 }
 0x8a1   :  { %1192 = vadd.xlane.f32.xlu0 %v1191_v6 }
 0x92e   :  { %v1193_v7 = vpop.xlane.xlu0 %1192 }
 0x92f   :  { %v1194_v8 = vrot.slane %v1193_v7, 4 }
 0x931   :  { %v1195_v9 = vadd.f32 %v1194_v8, %v1193_v7 }
 0x933   :  { %v1196_v10 = vrot.slane %v1195_v9, 2 }
 0x935   :  { %v1197_v11 = vadd.f32 %v1196_v10, %v1195_v9 }
 0x937   :  { %v1198_v12 = vrot.slane %v1197_v11, 1 }
 0x939   :  { %v1199_v13 = vadd.f32 %v1198_v12, %v1197_v11 }
 0x93b   :  { %1481 = vpush %v1199_v13 }
 0x96c   :  { %s1482_s17 = spop %1481 }
 0x96d   :  { %s1203_s1 = smul.f32 0.03125, %s1482_s17 }
 0x96f   :  { %v1204_v14 = vstv %s1203_s1 }
 0x970   :  { %1205 = vst [vmem:[#allocation28] sm:$0x1] %v1204_v14 }
 0x971   :  { %1931 = shalt.err (!%p1928_p6)
}
 0x972   :  { %s2342_s23 = sld [smem:[#allocation40_spill]] }
 0x978   :  { %s1932_s18 = scalar_lea.hbm %s2342_s23, 16 }
 0x979   :  { %p1933_p7 = scmp.ne.s32.totalorder %s2342_s23, %s1932_s18  ;;  %p1936_p8 = scmp.lt.u32.totalorder %s1932_s18, %s2342_s23 }
 0x97b   :  { %p1938_p9 = pnand %p1936_p8, %p1933_p7 }
 0x97d   :  { %1941 = shalt.err (!%p1938_p9)
}
 0x97e   :  { %1215 = dma.vmem_to_hbm [thread:$0]  %s1213_s0, 16, %s2342_s23, [#allocation4]  }
 0x97f   :  { %1960 = dma.done.wait [#allocation4], 16  }
 0x980   :  { %1961 = vsyncadd [#allocation4], 4294967280 }
 0x981   :  { %1219 = vsyncpa [#allocation3], 1 }
 0x982   :  { %1220 = vsyncpa [#allocation6], 1 }
 0x983   :  { %1221 = vsyncpa [#allocation9], 1 }
 0x984   :  { %1222 = vsyncpa [#allocation12], 1 }
 0x985   :  { %1223 = vsyncpa [#allocation15], 1 }
 0x986   :  { %1224 = vsyncpa [#allocation18], 1 }
 0x987   :  { %1225 = vsyncpa [#allocation21], 1 }
 0x988   :  { %1226 = vsyncpa [#allocation24], 1 }
 0x989   :  { %1227 = vsyncpa [#allocation27], 1 }
 0x98a   :  { %1228 = vsyncpa [#allocation4], 1 }

</bundles_post_ra>
